<compile_context>
chip_gen: v7x
topology: tpu7x:2x2x1
jax: 0.10.0
libtpu: 0.0.40
codegen_flags: <defaults>
</compile_context>

<pallas_src>
import functools

import jax
import jax.numpy as jnp
from jax import lax
from jax.experimental import pallas as pl
from jax.experimental.pallas import tpu as pltpu

_EPS = 1e-5          # nn.BatchNorm3d default eps
_LANE = 128          # TPU lane width
_SUBLANE = 8         # f32 sublane tiling


def _round_up(x, m):
    return (x + m - 1) // m * m


def _vmem_limit_bytes(per_step_bytes):
    # double-buffered pipeline stages + generous headroom, capped well under
    # v7x's 64 MiB physical VMEM.
    need = 2 * per_step_bytes
    return int(min(max(4 * need, 16 << 20), 48 << 20))


def _pick_tile(m, tile_m):
    return min(_round_up(tile_m, _SUBLANE), _round_up(m, _SUBLANE))


# ---------------------------------------------------------------------------
# Pallas kernels
# ---------------------------------------------------------------------------
def _conv_stats_kernel(p_ref, w_ref, y_ref, stats_ref):
    """One M-tile: single K-folded MXU matmul + one-pass per-tile sum/sumsq."""
    y = jnp.dot(p_ref[...], w_ref[...], preferred_element_type=jnp.float32)
    y_ref[...] = y
    s = jnp.sum(y, axis=0, keepdims=True)           # (1, Cpad)
    ss = jnp.sum(y * y, axis=0, keepdims=True)      # (1, Cpad)
    row = lax.broadcasted_iota(jnp.int32, (_SUBLANE, y.shape[1]), 0)
    stats_ref[0] = jnp.where(row == 0, s, jnp.where(row == 1, ss, 0.0))


def _bn_relu_kernel(y_ref, scale_ref, shift_ref, out_ref):
    out_ref[...] = jnp.maximum(y_ref[...] * scale_ref[...] + shift_ref[...], 0.0)


def _bn_add_relu_kernel(y_ref, scale_ref, shift_ref, res_ref, out_ref):
    out_ref[...] = jnp.maximum(
        y_ref[...] * scale_ref[...] + shift_ref[...] + res_ref[...], 0.0)


# ---------------------------------------------------------------------------
# pallas_call wrappers
# ---------------------------------------------------------------------------
def _conv_stats(patches, w, tile_m):
    m_pad, kpad = patches.shape
    cpad = w.shape[1]
    num_tiles = m_pad // tile_m
    per_step = (tile_m * kpad * patches.dtype.itemsize
                + kpad * cpad * w.dtype.itemsize
                + tile_m * cpad * 4 + _SUBLANE * cpad * 4)
    cost = pl.CostEstimate(
        flops=2 * m_pad * kpad * cpad + 3 * m_pad * cpad,
        transcendentals=0,
        bytes_accessed=(patches.size * patches.dtype.itemsize
                        + w.size * w.dtype.itemsize
                        + m_pad * cpad * 4 + num_tiles * _SUBLANE * cpad * 4))
    return pl.pallas_call(
        _conv_stats_kernel,
        out_shape=(jax.ShapeDtypeStruct((m_pad, cpad), jnp.float32),
                   jax.ShapeDtypeStruct((num_tiles, _SUBLANE, cpad), jnp.float32)),
        grid=(num_tiles,),
        in_specs=[pl.BlockSpec((tile_m, kpad), lambda i: (i, 0)),
                  pl.BlockSpec((kpad, cpad), lambda i: (0, 0))],
        out_specs=(pl.BlockSpec((tile_m, cpad), lambda i: (i, 0)),
                   pl.BlockSpec((1, _SUBLANE, cpad), lambda i: (i, 0, 0))),
        compiler_params=pltpu.CompilerParams(
            dimension_semantics=("parallel",),
            vmem_limit_bytes=_vmem_limit_bytes(per_step)),
        cost_estimate=cost,
    )(patches, w)


def _bn_relu(y, scale, shift, residual, tile_m):
    m_pad, cpad = y.shape
    num_tiles = m_pad // tile_m
    in_specs = [pl.BlockSpec((tile_m, cpad), lambda i: (i, 0)),
                pl.BlockSpec((1, cpad), lambda i: (0, 0)),
                pl.BlockSpec((1, cpad), lambda i: (0, 0))]
    args = [y, scale, shift]
    kernel = _bn_relu_kernel
    per_step = 2 * tile_m * cpad * 4 + 2 * cpad * 4
    if residual is not None:
        in_specs.append(pl.BlockSpec((tile_m, cpad), lambda i: (i, 0)))
        args.append(residual)
        kernel = _bn_add_relu_kernel
        per_step += tile_m * cpad * 4
    cost = pl.CostEstimate(
        flops=4 * m_pad * cpad,
        transcendentals=0,
        bytes_accessed=(sum(a.size * a.dtype.itemsize for a in args)
                        + m_pad * cpad * 4))
    return pl.pallas_call(
        kernel,
        out_shape=jax.ShapeDtypeStruct((m_pad, cpad), jnp.float32),
        grid=(num_tiles,),
        in_specs=in_specs,
        out_specs=pl.BlockSpec((tile_m, cpad), lambda i: (i, 0)),
        compiler_params=pltpu.CompilerParams(
            dimension_semantics=("parallel",),
            vmem_limit_bytes=_vmem_limit_bytes(per_step)),
        cost_estimate=cost,
    )(*args)


# ---------------------------------------------------------------------------
# JAX glue: im2col for 3x3x3 / padding=1 conv (pure data movement), BN finalize
# ---------------------------------------------------------------------------
def _im2col3d_flat(x_ndhwc, stride, kpad, dtype):
    n, d, h, w, c = x_ndhwc.shape
    do = (d - 1) // stride + 1
    ho = (h - 1) // stride + 1
    wo = (w - 1) // stride + 1
    xp = jnp.pad(x_ndhwc, ((0, 0), (1, 1), (1, 1), (1, 1), (0, 0)))
    cols = []
    for kd in range(3):
        for kh in range(3):
            for kw in range(3):
                sl = xp[:, kd:kd + (do - 1) * stride + 1:stride,
                           kh:kh + (ho - 1) * stride + 1:stride,
                           kw:kw + (wo - 1) * stride + 1:stride, :]
                cols.append(sl.reshape(n * do * ho * wo, c))
    patches = jnp.concatenate(cols, axis=-1)                 # (M, 27*C), K = k*C + c
    patches = jnp.pad(patches, ((0, 0), (0, kpad - 27 * c))).astype(dtype)
    return patches, (n, do, ho, wo)


def _pad_weight(w3, kpad, cpad, dtype):
    kk, cin, cout = w3.shape
    w2d = w3.reshape(kk * cin, cout)                          # row = k*Cin + cin
    return jnp.pad(w2d, ((0, kpad - kk * cin), (0, cpad - cout))).astype(dtype)


def _finalize_bn(stats, m_true, gamma, beta, cpad):
    """Fold per-tile sum/sumsq into per-channel scale/shift (global batch stats)."""
    s = jnp.sum(stats[:, 0, :], axis=0)
    ss = jnp.sum(stats[:, 1, :], axis=0)
    mean = s / m_true
    var = jnp.maximum(ss / m_true - mean * mean, 0.0)
    g = jnp.pad(gamma.reshape(-1), (0, cpad - gamma.size), constant_values=1.0)
    b = jnp.pad(beta.reshape(-1), (0, cpad - beta.size))
    scale = g * lax.rsqrt(var + _EPS)
    shift = b - mean * scale
    return scale.reshape(1, cpad), shift.reshape(1, cpad)


# ---------------------------------------------------------------------------
# Parameters (deterministic synthetic init, mirrors __init__ shapes)
# ---------------------------------------------------------------------------
def init_basic_block_params(key, in_channels, out_channels, expansion=1):
    k1, k2 = jax.random.split(key)
    b1 = 1.0 / jnp.sqrt(in_channels * 27)
    b2 = 1.0 / jnp.sqrt(out_channels * 27)
    # weights stored as (27, Cin, Cout) ~ PyTorch (Cout, Cin, 3, 3, 3) transposed
    w1 = jax.random.uniform(k1, (27, in_channels, out_channels), jnp.float32, -b1, b1)
    w2 = jax.random.uniform(k2, (27, out_channels, out_channels * expansion),
                            jnp.float32, -b2, b2)
    return dict(
        w1=w1, w2=w2,
        gamma1=jnp.ones((1, out_channels), jnp.float32),
        beta1=jnp.zeros((1, out_channels), jnp.float32),
        gamma2=jnp.ones((1, out_channels * expansion), jnp.float32),
        beta2=jnp.zeros((1, out_channels * expansion), jnp.float32),
    )


# ---------------------------------------------------------------------------
# BasicBlock forward (Pallas hot path)
# ---------------------------------------------------------------------------
@functools.partial(jax.jit, static_argnames=("stride", "tile_m", "matmul_dtype"))
def basic_block_forward(x_ncdhw, params, stride=1, tile_m=512,
                        matmul_dtype=jnp.bfloat16):
    x = jnp.transpose(x_ncdhw, (0, 2, 3, 4, 1))              # NCDHW -> NDHWC
    n, d, h, w, cin = x.shape
    cout = params["w1"].shape[2]
    cexp = params["w2"].shape[2]

    k1p = _round_up(27 * cin, _LANE)
    c1p = _round_up(cout, _LANE)
    k2p = _round_up(27 * cout, _LANE)
    c2p = _round_up(cexp, _LANE)

    # ---- conv1 -> bn1 -> relu ----
    patches1, (n, do, ho, wo) = _im2col3d_flat(x, stride, k1p, matmul_dtype)
    m1 = patches1.shape[0]
    tm1 = _pick_tile(m1, tile_m)
    m1p = _round_up(m1, tm1)
    patches1 = jnp.pad(patches1, ((0, m1p - m1), (0, 0)))
    w1 = _pad_weight(params["w1"], k1p, c1p, matmul_dtype)
    y1, stats1 = _conv_stats(patches1, w1, tm1)
    scale1, shift1 = _finalize_bn(stats1, m1, params["gamma1"], params["beta1"], c1p)
    act1 = _bn_relu(y1, scale1, shift1, None, tm1)
    act1 = act1[:m1, :cout].reshape(n, do, ho, wo, cout)

    # ---- conv2 -> bn2 -> (+identity) -> relu ----
    patches2, _ = _im2col3d_flat(act1, 1, k2p, matmul_dtype)
    m2 = patches2.shape[0]
    tm2 = _pick_tile(m2, tile_m)
    m2p = _round_up(m2, tm2)
    patches2 = jnp.pad(patches2, ((0, m2p - m2), (0, 0)))
    w2 = _pad_weight(params["w2"], k2p, c2p, matmul_dtype)
    y2, stats2 = _conv_stats(patches2, w2, tm2)
    scale2, shift2 = _finalize_bn(stats2, m2, params["gamma2"], params["beta2"], c2p)

    # Identity residual (valid for the default stride==1 / downsample=None config).
    # TODO(synk): projection downsample (stride != 1 or channel change) not implemented.
    identity = x.reshape(n * d * h * w, cin)
    identity = jnp.pad(identity, ((0, m2p - identity.shape[0]), (0, c2p - cin)))
    out = _bn_relu(y2, scale2, shift2, identity, tm2)
    out = out[:m2, :cexp].reshape(n, do, ho, wo, cexp)
    return jnp.transpose(out, (0, 4, 1, 2, 3))               # back to NCDHW


# ---------------------------------------------------------------------------
# Pure-JAX reference (for sanity checking the kernel)
# ---------------------------------------------------------------------------
def _bn_train_ref(y, gamma, beta):
    mean = jnp.mean(y, axis=(0, 2, 3, 4), keepdims=True)
    var = jnp.mean((y - mean) ** 2, axis=(0, 2, 3, 4), keepdims=True)
    g = gamma.reshape(1, -1, 1, 1, 1)
    b = beta.reshape(1, -1, 1, 1, 1)
    return (y - mean) * lax.rsqrt(var + _EPS) * g + b


def reference_forward(x, params, stride=1, quantize=None):
    """f32 reference; `quantize` rounds matmul operands like the kernel does."""
    if quantize is None:
        q = lambda v: v
    else:
        q = lambda v: v.astype(quantize).astype(jnp.float32)
    cin = params["w1"].shape[1]
    cout = params["w1"].shape[2]
    cexp = params["w2"].shape[2]
    dn = ("NCDHW", "OIDHW", "NCDHW")
    w1 = jnp.transpose(params["w1"].reshape(3, 3, 3, cin, cout), (4, 3, 0, 1, 2))
    w2 = jnp.transpose(params["w2"].reshape(3, 3, 3, cout, cexp), (4, 3, 0, 1, 2))
    out = lax.conv_general_dilated(q(x), q(w1), (stride,) * 3, [(1, 1)] * 3,
                                   dimension_numbers=dn,
                                   precision=lax.Precision.HIGHEST)
    out = jnp.maximum(_bn_train_ref(out, params["gamma1"].ravel(),
                                    params["beta1"].ravel()), 0.0)
    out = lax.conv_general_dilated(q(out), q(w2), (1,) * 3, [(1, 1)] * 3,
                                   dimension_numbers=dn,
                                   precision=lax.Precision.HIGHEST)
    out = _bn_train_ref(out, params["gamma2"].ravel(), params["beta2"].ravel())
    out = out + x
    return jnp.maximum(out, 0.0)


if __name__ == "__main__":
    key = jax.random.PRNGKey(0)
    kx, kp = jax.random.split(key)

    N, C, D, H, W = 2, 4, 16, 16, 16                 # small NCDHW input
    x = jax.random.normal(kx, (N, C, D, H, W), jnp.float32)
    params = init_basic_block_params(kp, in_channels=C, out_channels=C, expansion=1)

    out = basic_block_forward(x, params, stride=1)
    out = jax.block_until_ready(out)
    assert out.shape == (N, C, D, H, W), out.shape

    # Tight check vs a reference whose matmul operands are bf16-rounded exactly
    # like the kernel's (accumulation is f32 in both paths).
    ref_q = reference_forward(x, params, stride=1, quantize=jnp.bfloat16)
    err_q = float(jnp.max(jnp.abs(out - ref_q)))
    assert err_q < 1e-2, f"mismatch vs bf16-operand reference: {err_q}"

    # Loose sanity bound vs the full-f32 reference (bf16 quantization noise only).
    ref_f32 = reference_forward(x, params, stride=1)
    err_f32 = float(jnp.max(jnp.abs(out - ref_f32)))
    assert err_f32 < 0.3, f"mismatch vs f32 reference: {err_f32}"

    print("KERNEL_OK")
</pallas_src>

<mosaic_0001>
module attributes {stable_mosaic.version = 11 : i64} {
  func.func @_conv_stats_kernel(%arg0: i32, %arg1: memref<512x128xbf16, #tpu.memory_space<vmem>>, %arg2: memref<128x128xbf16, #tpu.memory_space<vmem>>, %arg3: memref<512x128xf32, #tpu.memory_space<vmem>>, %arg4: memref<1x8x128xf32, #tpu.memory_space<vmem>>) attributes {dimension_semantics = [#tpu.dimension_semantics<parallel>], iteration_bounds = array<i64: 16>, scalar_prefetch = 0 : i64, scratch_operands = 0 : i64, tpu.core_type = #tpu.core_type<tc>, window_params = [{transform_indices = @transform_0, window_bounds = array<i64: 512, 128>}, {pipeline_mode = #tpu.pipeline_mode<synchronous>, transform_indices = @transform_1, window_bounds = array<i64: 128, 128>}, {transform_indices = @transform_2, window_bounds = array<i64: 512, 128>}, {transform_indices = @transform_3, window_bounds = array<i64: 1, 8, 128>}]} {
    %c0 = arith.constant 0 : index
    %c0_0 = arith.constant 0 : index
    %0 = vector.load %arg1[%c0, %c0_0] : memref<512x128xbf16, #tpu.memory_space<vmem>>, vector<512x128xbf16>
    %c0_1 = arith.constant 0 : index
    %c0_2 = arith.constant 0 : index
    %1 = vector.load %arg2[%c0_1, %c0_2] : memref<128x128xbf16, #tpu.memory_space<vmem>>, vector<128x128xbf16>
    %cst = arith.constant dense<0.000000e+00> : vector<512x128xf32>
    %2 = tpu.matmul %0, %1, %cst {dimension_numbers = #tpu.dot_dimension_numbers<[1], [0], [0], [1], [0, 0, 1, 1], [], []>} : vector<512x128xbf16>, vector<128x128xbf16>, vector<512x128xf32> -> vector<512x128xf32>
    %c0_3 = arith.constant 0 : index
    %c0_4 = arith.constant 0 : index
    %3 = vector.load %arg3[%c0_3, %c0_4] : memref<512x128xf32, #tpu.memory_space<vmem>>, vector<512x128xf32>
    tpu.vector_store %arg3[%c0_3, %c0_4], %2 {strides = array<i32>} : memref<512x128xf32, #tpu.memory_space<vmem>>, vector<512x128xf32>,
    %cst_5 = arith.constant dense<0.000000e+00> : vector<128xf32>
    %4 = vector.multi_reduction <add>, %2, %cst_5 [0] : vector<512x128xf32> to vector<128xf32>
    %5 = vector.shape_cast %4 : vector<128xf32> to vector<1x128xf32>
    %6 = arith.mulf %2, %2 : vector<512x128xf32>
    %cst_6 = arith.constant dense<0.000000e+00> : vector<128xf32>
    %7 = vector.multi_reduction <add>, %6, %cst_6 [0] : vector<512x128xf32> to vector<128xf32>
    %8 = vector.shape_cast %7 : vector<128xf32> to vector<1x128xf32>
    %9 = tpu.iota {dimensions = array<i32: 0>} : vector<8x128xi32>
    %c0_i32 = arith.constant 0 : i32
    %10 = vector.broadcast %c0_i32 : i32 to vector<8x128xi32>
    %11 = arith.cmpi eq, %9, %10 : vector<8x128xi32>
    %c1_i32 = arith.constant 1 : i32
    %12 = vector.broadcast %c1_i32 : i32 to vector<8x128xi32>
    %13 = arith.cmpi eq, %9, %12 : vector<8x128xi32>
    %cst_7 = arith.constant 0.000000e+00 : f32
    %14 = vector.shape_cast %8 : vector<1x128xf32> to vector<1x128xf32>
    %15 = vector.broadcast %14 : vector<1x128xf32> to vector<8x128xf32>
    %16 = vector.broadcast %cst_7 : f32 to vector<8x128xf32>
    %17 = arith.select %13, %15, %16 : vector<8x128xi1>, vector<8x128xf32>
    %18 = vector.shape_cast %5 : vector<1x128xf32> to vector<1x128xf32>
    %19 = vector.broadcast %18 : vector<1x128xf32> to vector<8x128xf32>
    %20 = arith.select %11, %19, %17 : vector<8x128xi1>, vector<8x128xf32>
    %c0_8 = arith.constant 0 : index
    %c0_9 = arith.constant 0 : index
    %c0_10 = arith.constant 0 : index
    %21 = vector.load %arg4[%c0_8, %c0_9, %c0_10] : memref<1x8x128xf32, #tpu.memory_space<vmem>>, vector<1x8x128xf32>
    %22 = vector.shape_cast %21 : vector<1x8x128xf32> to vector<8x128xf32>
    %23 = vector.shape_cast %20 : vector<8x128xf32> to vector<1x8x128xf32>
    tpu.vector_store %arg4[%c0_8, %c0_9, %c0_10], %23 {strides = array<i32>} : memref<1x8x128xf32, #tpu.memory_space<vmem>>, vector<1x8x128xf32>,
    return
  }
  func.func @transform_0(%arg0: i32) -> (i32, i32) {
    %c0_i32 = arith.constant 0 : i32
    %c0_i32_0 = arith.constant 0 : i32
    return %arg0, %c0_i32 : i32, i32
  }
  func.func @transform_1(%arg0: i32) -> (i32, i32) {
    %c0_i32 = arith.constant 0 : i32
    %c0_i32_0 = arith.constant 0 : i32
    %c0_i32_1 = arith.constant 0 : i32
    return %c0_i32, %c0_i32_0 : i32, i32
  }
  func.func @transform_2(%arg0: i32) -> (i32, i32) {
    %c0_i32 = arith.constant 0 : i32
    %c0_i32_0 = arith.constant 0 : i32
    return %arg0, %c0_i32 : i32, i32
  }
  func.func @transform_3(%arg0: i32) -> (i32, i32, i32) {
    %c0_i32 = arith.constant 0 : i32
    %c0_i32_0 = arith.constant 0 : i32
    %c0_i32_1 = arith.constant 0 : i32
    return %arg0, %c0_i32, %c0_i32_0 : i32, i32, i32
  }
}

module attributes {stable_mosaic.version = 11 : i64} {
  func.func @_bn_relu_kernel(%arg0: i32, %arg1: memref<512x128xf32, #tpu.memory_space<vmem>>, %arg2: memref<1x128xf32, #tpu.memory_space<vmem>>, %arg3: memref<1x128xf32, #tpu.memory_space<vmem>>, %arg4: memref<512x128xf32, #tpu.memory_space<vmem>>) attributes {dimension_semantics = [#tpu.dimension_semantics<parallel>], iteration_bounds = array<i64: 16>, scalar_prefetch = 0 : i64, scratch_operands = 0 : i64, tpu.core_type = #tpu.core_type<tc>, window_params = [{transform_indices = @transform_0, window_bounds = array<i64: 512, 128>}, {pipeline_mode = #tpu.pipeline_mode<synchronous>, transform_indices = @transform_1, window_bounds = array<i64: 1, 128>}, {pipeline_mode = #tpu.pipeline_mode<synchronous>, transform_indices = @transform_2, window_bounds = array<i64: 1, 128>}, {transform_indices = @transform_3, window_bounds = array<i64: 512, 128>}]} {
    %c0 = arith.constant 0 : index
    %c0_0 = arith.constant 0 : index
    %0 = vector.load %arg1[%c0, %c0_0] : memref<512x128xf32, #tpu.memory_space<vmem>>, vector<512x128xf32>
    %c0_1 = arith.constant 0 : index
    %c0_2 = arith.constant 0 : index
    %1 = vector.load %arg2[%c0_1, %c0_2] : memref<1x128xf32, #tpu.memory_space<vmem>>, vector<1x128xf32>
    %2 = vector.broadcast %1 : vector<1x128xf32> to vector<512x128xf32>
    %3 = arith.mulf %0, %2 : vector<512x128xf32>
    %c0_3 = arith.constant 0 : index
    %c0_4 = arith.constant 0 : index
    %4 = vector.load %arg3[%c0_3, %c0_4] : memref<1x128xf32, #tpu.memory_space<vmem>>, vector<1x128xf32>
    %5 = vector.broadcast %4 : vector<1x128xf32> to vector<512x128xf32>
    %6 = arith.addf %3, %5 : vector<512x128xf32>
    %cst = arith.constant 0.000000e+00 : f32
    %7 = vector.broadcast %cst : f32 to vector<512x128xf32>
    %8 = arith.maximumf %6, %7 : vector<512x128xf32>
    %c0_5 = arith.constant 0 : index
    %c0_6 = arith.constant 0 : index
    %9 = vector.load %arg4[%c0_5, %c0_6] : memref<512x128xf32, #tpu.memory_space<vmem>>, vector<512x128xf32>
    tpu.vector_store %arg4[%c0_5, %c0_6], %8 {strides = array<i32>} : memref<512x128xf32, #tpu.memory_space<vmem>>, vector<512x128xf32>,
    return
  }
  func.func @transform_0(%arg0: i32) -> (i32, i32) {
    %c0_i32 = arith.constant 0 : i32
    %c0_i32_0 = arith.constant 0 : i32
    return %arg0, %c0_i32 : i32, i32
  }
  func.func @transform_1(%arg0: i32) -> (i32, i32) {
    %c0_i32 = arith.constant 0 : i32
    %c0_i32_0 = arith.constant 0 : i32
    %c0_i32_1 = arith.constant 0 : i32
    return %c0_i32, %c0_i32_0 : i32, i32
  }
  func.func @transform_2(%arg0: i32) -> (i32, i32) {
    %c0_i32 = arith.constant 0 : i32
    %c0_i32_0 = arith.constant 0 : i32
    %c0_i32_1 = arith.constant 0 : i32
    return %c0_i32, %c0_i32_0 : i32, i32
  }
  func.func @transform_3(%arg0: i32) -> (i32, i32) {
    %c0_i32 = arith.constant 0 : i32
    %c0_i32_0 = arith.constant 0 : i32
    return %arg0, %c0_i32 : i32, i32
  }
}

module attributes {stable_mosaic.version = 11 : i64} {
  func.func @_bn_add_relu_kernel(%arg0: i32, %arg1: memref<512x128xf32, #tpu.memory_space<vmem>>, %arg2: memref<1x128xf32, #tpu.memory_space<vmem>>, %arg3: memref<1x128xf32, #tpu.memory_space<vmem>>, %arg4: memref<512x128xf32, #tpu.memory_space<vmem>>, %arg5: memref<512x128xf32, #tpu.memory_space<vmem>>) attributes {dimension_semantics = [#tpu.dimension_semantics<parallel>], iteration_bounds = array<i64: 16>, scalar_prefetch = 0 : i64, scratch_operands = 0 : i64, tpu.core_type = #tpu.core_type<tc>, window_params = [{transform_indices = @transform_0, window_bounds = array<i64: 512, 128>}, {pipeline_mode = #tpu.pipeline_mode<synchronous>, transform_indices = @transform_1, window_bounds = array<i64: 1, 128>}, {pipeline_mode = #tpu.pipeline_mode<synchronous>, transform_indices = @transform_2, window_bounds = array<i64: 1, 128>}, {transform_indices = @transform_3, window_bounds = array<i64: 512, 128>}, {transform_indices = @transform_4, window_bounds = array<i64: 512, 128>}]} {
    %c0 = arith.constant 0 : index
    %c0_0 = arith.constant 0 : index
    %0 = vector.load %arg1[%c0, %c0_0] : memref<512x128xf32, #tpu.memory_space<vmem>>, vector<512x128xf32>
    %c0_1 = arith.constant 0 : index
    %c0_2 = arith.constant 0 : index
    %1 = vector.load %arg2[%c0_1, %c0_2] : memref<1x128xf32, #tpu.memory_space<vmem>>, vector<1x128xf32>
    %2 = vector.broadcast %1 : vector<1x128xf32> to vector<512x128xf32>
    %3 = arith.mulf %0, %2 : vector<512x128xf32>
    %c0_3 = arith.constant 0 : index
    %c0_4 = arith.constant 0 : index
    %4 = vector.load %arg3[%c0_3, %c0_4] : memref<1x128xf32, #tpu.memory_space<vmem>>, vector<1x128xf32>
    %5 = vector.broadcast %4 : vector<1x128xf32> to vector<512x128xf32>
    %6 = arith.addf %3, %5 : vector<512x128xf32>
    %c0_5 = arith.constant 0 : index
    %c0_6 = arith.constant 0 : index
    %7 = vector.load %arg4[%c0_5, %c0_6] : memref<512x128xf32, #tpu.memory_space<vmem>>, vector<512x128xf32>
    %8 = arith.addf %6, %7 : vector<512x128xf32>
    %cst = arith.constant 0.000000e+00 : f32
    %9 = vector.broadcast %cst : f32 to vector<512x128xf32>
    %10 = arith.maximumf %8, %9 : vector<512x128xf32>
    %c0_7 = arith.constant 0 : index
    %c0_8 = arith.constant 0 : index
    %11 = vector.load %arg5[%c0_7, %c0_8] : memref<512x128xf32, #tpu.memory_space<vmem>>, vector<512x128xf32>
    tpu.vector_store %arg5[%c0_7, %c0_8], %10 {strides = array<i32>} : memref<512x128xf32, #tpu.memory_space<vmem>>, vector<512x128xf32>,
    return
  }
  func.func @transform_0(%arg0: i32) -> (i32, i32) {
    %c0_i32 = arith.constant 0 : i32
    %c0_i32_0 = arith.constant 0 : i32
    return %arg0, %c0_i32 : i32, i32
  }
  func.func @transform_1(%arg0: i32) -> (i32, i32) {
    %c0_i32 = arith.constant 0 : i32
    %c0_i32_0 = arith.constant 0 : i32
    %c0_i32_1 = arith.constant 0 : i32
    return %c0_i32, %c0_i32_0 : i32, i32
  }
  func.func @transform_2(%arg0: i32) -> (i32, i32) {
    %c0_i32 = arith.constant 0 : i32
    %c0_i32_0 = arith.constant 0 : i32
    %c0_i32_1 = arith.constant 0 : i32
    return %c0_i32, %c0_i32_0 : i32, i32
  }
  func.func @transform_3(%arg0: i32) -> (i32, i32) {
    %c0_i32 = arith.constant 0 : i32
    %c0_i32_0 = arith.constant 0 : i32
    return %arg0, %c0_i32 : i32, i32
  }
  func.func @transform_4(%arg0: i32) -> (i32, i32) {
    %c0_i32 = arith.constant 0 : i32
    %c0_i32_0 = arith.constant 0 : i32
    return %arg0, %c0_i32 : i32, i32
  }
}

</mosaic_0001>

<bundles_post_ra>
// kernel: basic_block_forward.4
= control target key start
LH: loop header
LB: loop body
LE: loop exit
PB: predicated region body
PF: predicated region fallthrough
CT: control target
= control target key end

     0   :  { %s1419_s12 = smov 0   ;;  %s1764_s0 = inlined_call_operand.vmem [shape: bf16[8192,128], index: 0, kind: input, shape index: {}]   ;;  %s1765_s1 = inlined_call_operand.vmem [shape: bf16[128,128], index: 1, kind: input, shape index: {}]   ;;  %s1766_s2 = inlined_call_operand.vmem [shape: f32[8192,128], index: 2, kind: output, shape index: {0}]   ;;  %s1767_s3 = inlined_call_operand.vmem [shape: f32[16,8,128], index: 3, kind: output, shape index: {1}]  }
   0x1 LB: > { %s1425_s13 = sadd.s32 4294967295, %s1397_s12   ;;  %p1159_p0 = scmp.ge.s32.totalorder %s1397_s12, 1  ;;  %s1397_s12 = sphi %s1419_s12, %s14_s12  }
   0x2   : > { %p141_p1 = scmp.lt.s32.totalorder %s1397_s12, 17 }
   0x4   : > { %p142_p2 = pnand %p1159_p0, %p141_p1 }
   0x5   : > { %v1351_v0 = vld [vmem:[%s1765_s1] sm:$0xff] (!%p142_p2)   ;;  %s1160_s16 = sshll.u32 (!%p142_p2), %s1425_s13, 6  ;;  %v1352_v1 = vld [vmem:[%s1765_s1 + $0x8] sm:$0xff] (!%p142_p2)   ;;  %v1353_v2 = vld [vmem:[%s1765_s1 + $0x10] sm:$0xff] (!%p142_p2)   ;;  %p181_p4 = scmp.lt.s32.totalorder (!%p142_p2), %s1425_s13, 15 }
   0x6   : > { %145 = sbr.rel (%p142_p2) target bundleno = 396 (0x18c), region = 28  ;;  %p170_p3 = scmp.lt.s32.totalorder (!%p142_p2), %s1160_s16, 1023  ;;  %1247 = vmatprep.subr.bf16.mxu0 (!%p142_p2), %v1351_v0  ;;  %1327 = vmatprep.subr.bf16.mxu1 (!%p142_p2), %v1351_v0  ;;  %v1354_v3 = vld [vmem:[%s1765_s1 + $0x18] sm:$0xff] (!%p142_p2)   ;;  %v1355_v5 = vld [vmem:[%s1765_s1 + $0x20] sm:$0xff] (!%p142_p2)   ;;  %v1356_v6 = vld [vmem:[%s1765_s1 + $0x28] sm:$0xff] (!%p142_p2)  }
   0x7   : > { %1248 = vmatpush3.bf16.msra.mxu0 (!%p142_p2), %v1351_v0  ;;  %1335 = vmatpush3.bf16.msra.mxu1 (!%p142_p2), %v1351_v0  ;;  %v1357_v7 = vld [vmem:[%s1765_s1 + $0x30] sm:$0xff] (!%p142_p2)   ;;  %v1358_v8 = vld [vmem:[%s1765_s1 + $0x38] sm:$0xff] (!%p142_p2)  }
   0x8   : > { %1249 = vmatprep.subr.bf16.mxu0 (!%p142_p2), %v1352_v1  ;;  %1328 = vmatprep.subr.bf16.mxu1 (!%p142_p2), %v1352_v1 }
   0xb   : > { %1250 = vmatpush3.bf16.msra.mxu0 (!%p142_p2), %v1352_v1  ;;  %1336 = vmatpush3.bf16.msra.mxu1 (!%p142_p2), %v1352_v1 }
   0xc   : > { %1251 = vmatprep.subr.bf16.mxu0 (!%p142_p2), %v1353_v2  ;;  %1329 = vmatprep.subr.bf16.mxu1 (!%p142_p2), %v1353_v2 }
   0xd   : > { %s1769_s16 = smov (!%p170_p3, %s1160_s16), 1023  ;;  %s1771_s13 = smov (!%p181_p4, %s1425_s13), 15 }
   0xe   : > { %s1161_s21 = sshll.u32 %s1769_s16, 2  ;;  %s1163_s8 = sshll.u32 %s1769_s16, 3 }
   0xf   : > { %s1445_s24 = scalar_lea.vmem %s1764_s0, %s1161_s21  ;;  %1252 = vmatpush3.bf16.msra.mxu0 %v1353_v2  ;;  %1337 = vmatpush3.bf16.msra.mxu1 %v1353_v2  ;;  %s1498_s11 = scalar_lea.vmem %s1766_s2, %s1163_s8 }
  0x10   : > { %v1359_v4 = vld [vmem:[%s1445_s24] sm:$0xff]   ;;  %1253 = vmatprep.subr.bf16.mxu0 %v1354_v3  ;;  %1330 = vmatprep.subr.bf16.mxu1 %v1354_v3  ;;  %v1360_v10 = vld [vmem:[%s1445_s24 + $0x8] sm:$0xff]   ;;  %v1361_v11 = vld [vmem:[%s1445_s24 + $0x10] sm:$0xff]   ;;  %s1164_s14 = sshll.u32 %s1771_s13, 3 }
  0x11   : > { %1263 = vmatprep.mubr.bf16.mxu0 %v1359_v4  ;;  %v1375_v9 = vld [vmem:[%s1445_s24 + $0x80] sm:$0xff]   ;;  %v1376_v12 = vld [vmem:[%s1445_s24 + $0x88] sm:$0xff]   ;;  %v1377_v13 = vld [vmem:[%s1445_s24 + $0x90] sm:$0xff]   ;;  %s184_s17 = scalar_lea.vmem %s1767_s3, %s1164_s14 }
  0x12   : > { %1295 = vmatprep.mubr.bf16.mxu1 %v1375_v9  ;;  %v1362_v14 = vld [vmem:[%s1445_s24 + $0x18] sm:$0xff]   ;;  %v1363_v15 = vld [vmem:[%s1445_s24 + $0x20] sm:$0xff]   ;;  %v1364_v18 = vld [vmem:[%s1445_s24 + $0x28] sm:$0xff]  }
  0x13   : > { %1254 = vmatpush3.bf16.msra.mxu0 %v1354_v3  ;;  %1338 = vmatpush3.bf16.msra.mxu1 %v1354_v3  ;;  %v1378_v16 = vld [vmem:[%s1445_s24 + $0x98] sm:$0xff]   ;;  %v1379_v17 = vld [vmem:[%s1445_s24 + $0xa0] sm:$0xff]   ;;  %v1380_v19 = vld [vmem:[%s1445_s24 + $0xa8] sm:$0xff]  }
  0x14   : > { %1255 = vmatprep.subr.bf16.mxu0 %v1355_v5  ;;  %1331 = vmatprep.subr.bf16.mxu1 %v1355_v5  ;;  %v1365_v20 = vld [vmem:[%s1445_s24 + $0x30] sm:$0xff]   ;;  %v1366_v22 = vld [vmem:[%s1445_s24 + $0x38] sm:$0xff]   ;;  %v1367_v24 = vld [vmem:[%s1445_s24 + $0x40] sm:$0xff]  }
  0x15   : > { %v1381_v21 = vld [vmem:[%s1445_s24 + $0xb0] sm:$0xff]   ;;  %v1382_v23 = vld [vmem:[%s1445_s24 + $0xb8] sm:$0xff]   ;;  %v1383_v25 = vld [vmem:[%s1445_s24 + $0xc0] sm:$0xff]  }
  0x16   : > { %v1368_v26 = vld [vmem:[%s1445_s24 + $0x48] sm:$0xff]   ;;  %v1369_v28 = vld [vmem:[%s1445_s24 + $0x50] sm:$0xff]   ;;  %v1370_v30 = vld [vmem:[%s1445_s24 + $0x58] sm:$0xff]  }
  0x17   : > { %1256 = vmatpush3.bf16.msra.mxu0 %v1355_v5  ;;  %1339 = vmatpush3.bf16.msra.mxu1 %v1355_v5  ;;  %v1384_v27 = vld [vmem:[%s1445_s24 + $0xc8] sm:$0xff]   ;;  %v1385_v29 = vld [vmem:[%s1445_s24 + $0xd0] sm:$0xff]   ;;  %v1386_v31 = vld [vmem:[%s1445_s24 + $0xd8] sm:$0xff]  }
  0x18   : > { %1257 = vmatprep.subr.bf16.mxu0 %v1356_v6  ;;  %1332 = vmatprep.subr.bf16.mxu1 %v1356_v6  ;;  %v1371_v32 = vld [vmem:[%s1445_s24 + $0x60] sm:$0xff]   ;;  %v1372_v34 = vld [vmem:[%s1445_s24 + $0x68] sm:$0xff]   ;;  %v1373_v36 = vld [vmem:[%s1445_s24 + $0x70] sm:$0xff]  }
  0x19   : > { %v1387_v33 = vld [vmem:[%s1445_s24 + $0xe0] sm:$0xff]   ;;  %v1388_v35 = vld [vmem:[%s1445_s24 + $0xe8] sm:$0xff]   ;;  %v1389_v37 = vld [vmem:[%s1445_s24 + $0xf0] sm:$0xff]  }
  0x1a   : > { %v1374_v38 = vld [vmem:[%s1445_s24 + $0x78] sm:$0xff]  }
  0x1b   : > { %1258 = vmatpush3.bf16.msra.mxu0 %v1356_v6  ;;  %1340 = vmatpush3.bf16.msra.mxu1 %v1356_v6  ;;  %v1390_v39 = vld [vmem:[%s1445_s24 + $0xf8] sm:$0xff]  }
  0x1c   : > { %1259 = vmatprep.subr.bf16.mxu0 %v1357_v7  ;;  %1333 = vmatprep.subr.bf16.mxu1 %v1357_v7 }
  0x1f   : > { %1260 = vmatpush3.bf16.msra.mxu0 %v1357_v7  ;;  %1341 = vmatpush3.bf16.msra.mxu1 %v1357_v7 }
  0x20   : > { %1261 = vmatprep.subr.bf16.mxu0 %v1358_v8  ;;  %1334 = vmatprep.subr.bf16.mxu1 %v1358_v8 }
  0x23   : > { %1262 = vmatpush3.bf16.msra.mxu0 %v1358_v8  ;;  %1342 = vmatpush3.bf16.msra.mxu1 %v1358_v8 }
  0x26   : > { %1264 = vmatmul.mubr.bf16.vlgmr.msra.gmra.mrb[0].mxu0 %v1360_v10  ;;  %1296 = vmatmul.mubr.bf16.vlgmr.msra.gmra.mrb[0].mxu1 %v1376_v12 }
  0x27   : > { %1267 = vmatprep.mubr.bf16.mxu0 %v1361_v11  ;;  %1299 = vmatprep.mubr.bf16.mxu1 %v1377_v13 }
  0x2e   : > { %1268 = vmatmul.mubr.bf16.gmra.mrb[4].mxu0 %v1362_v14  ;;  %1300 = vmatmul.mubr.bf16.gmra.mrb[4].mxu1 %v1378_v16 }
  0x2f   : > { %1271 = vmatprep.mubr.bf16.mxu0 %v1363_v15  ;;  %1303 = vmatprep.mubr.bf16.mxu1 %v1379_v17 }
  0x36   : > { %1272 = vmatmul.mubr.bf16.gmra.mrb[8].mxu0 %v1364_v18  ;;  %1304 = vmatmul.mubr.bf16.gmra.mrb[8].mxu1 %v1380_v19 }
  0x37   : > { %1275 = vmatprep.mubr.bf16.mxu0 %v1365_v20  ;;  %1307 = vmatprep.mubr.bf16.mxu1 %v1381_v21 }
  0x3e   : > { %1276 = vmatmul.mubr.bf16.gmra.mrb[12].mxu0 %v1366_v22  ;;  %1308 = vmatmul.mubr.bf16.gmra.mrb[12].mxu1 %v1382_v23 }
  0x3f   : > { %1279 = vmatprep.mubr.bf16.mxu0 %v1367_v24  ;;  %1311 = vmatprep.mubr.bf16.mxu1 %v1383_v25 }
  0x46   : > { %1280 = vmatmul.mubr.bf16.gmra.mrb[16].mxu0 %v1368_v26  ;;  %1312 = vmatmul.mubr.bf16.gmra.mrb[16].mxu1 %v1384_v27 }
  0x47   : > { %1283 = vmatprep.mubr.bf16.mxu0 %v1369_v28  ;;  %1315 = vmatprep.mubr.bf16.mxu1 %v1385_v29 }
  0x4e   : > { %1284 = vmatmul.mubr.bf16.gmra.mrb[20].mxu0 %v1370_v30  ;;  %1316 = vmatmul.mubr.bf16.gmra.mrb[20].mxu1 %v1386_v31 }
  0x4f   : > { %1287 = vmatprep.mubr.bf16.mxu0 %v1371_v32  ;;  %1319 = vmatprep.mubr.bf16.mxu1 %v1387_v33 }
  0x56   : > { %1288 = vmatmul.mubr.bf16.gmra.mrb[24].mxu0 %v1372_v34  ;;  %1320 = vmatmul.mubr.bf16.gmra.mrb[24].mxu1 %v1388_v35 }
  0x57   : > { %1291 = vmatprep.mubr.bf16.mxu0 %v1373_v36  ;;  %1323 = vmatprep.mubr.bf16.mxu1 %v1389_v37 }
  0x5e   : > { %1292 = vmatmul.mubr.bf16.gmra.mrb[28].mxu0 %v1374_v38  ;;  %1324 = vmatmul.mubr.bf16.gmra.mrb[28].mxu1 %v1390_v39 }
  0xf9   : > { %v1265_v40 = vpop.f32.mrb[0].mxu0  ;;  %v1500_v41 = vpop.f32.mrb[0].mxu1 }
  0xfa   : > { %797 = vst [vmem:[%s1498_s11 + $0x10] sm:$0xff] %v1265_v40  ;;  %v540_v42 = vpop.f32.mrb[1].mxu0  ;;  %829 = vst [vmem:[%s1498_s11 + $0x110] sm:$0xff] %v1500_v41  ;;  %v1505_v43 = vpop.f32.mrb[1].mxu1  ;;  %v930_v51 = vmul.f32 %v1265_v40, %v1265_v40 }
  0xfb   : > { %795 = vst [vmem:[%s1498_s11] sm:$0xff] %v540_v42  ;;  %v1266_v44 = vpop.f32.mrb[2].mxu0  ;;  %827 = vst [vmem:[%s1498_s11 + $0x100] sm:$0xff] %v1505_v43  ;;  %v1510_v45 = vpop.f32.mrb[2].mxu1  ;;  %v928_v48 = vmul.f32 %v540_v42, %v540_v42 }
  0xfc   : > { %798 = vst [vmem:[%s1498_s11 + $0x18] sm:$0xff] %v1266_v44  ;;  %v543_v46 = vpop.f32.mrb[3].mxu0  ;;  %830 = vst [vmem:[%s1498_s11 + $0x118] sm:$0xff] %v1510_v45  ;;  %v1515_v47 = vpop.f32.mrb[3].mxu1  ;;  %v931_v54 = vmul.f32 %v1266_v44, %v1266_v44 }
  0xfd   : > { %796 = vst [vmem:[%s1498_s11 + $0x8] sm:$0xff] %v543_v46  ;;  %v859_v49 = vadd.f32 %v543_v46, %v540_v42  ;;  %v929_v50 = vmul.f32 %v543_v46, %v543_v46  ;;  %828 = vst [vmem:[%s1498_s11 + $0x108] sm:$0xff] %v1515_v47 }
  0xff   : > { %v860_v52 = vadd.f32 %v1265_v40, %v859_v49  ;;  %v992_v53 = vadd.f32 %v929_v50, %v928_v48 }
 0x101   : > { %v993_v55 = vadd.f32 %v992_v53, %v930_v51  ;;  %v1269_v56 = vpop.f32.mrb[4].mxu0  ;;  %v861_v57 = vadd.f32 %v1266_v44, %v860_v52  ;;  %v1520_v58 = vpop.f32.mrb[4].mxu1 }
 0x102   : > { %801 = vst [vmem:[%s1498_s11 + $0x30] sm:$0xff] %v1269_v56  ;;  %v556_v59 = vpop.f32.mrb[5].mxu0  ;;  %833 = vst [vmem:[%s1498_s11 + $0x130] sm:$0xff] %v1520_v58  ;;  %v1525_v60 = vpop.f32.mrb[5].mxu1  ;;  %v934_v7 = vmul.f32 %v1269_v56, %v1269_v56 }
 0x103   : > { %799 = vst [vmem:[%s1498_s11 + $0x20] sm:$0xff] %v556_v59  ;;  %v862_v61 = vadd.f32 %v861_v57, %v556_v59  ;;  %v932_v62 = vmul.f32 %v556_v59, %v556_v59  ;;  %v994_v63 = vadd.f32 %v993_v55, %v931_v54  ;;  %v1270_v0 = vpop.f32.mrb[6].mxu0  ;;  %831 = vst [vmem:[%s1498_s11 + $0x120] sm:$0xff] %v1525_v60  ;;  %v1530_v1 = vpop.f32.mrb[6].mxu1 }
 0x104   : > { %802 = vst [vmem:[%s1498_s11 + $0x38] sm:$0xff] %v1270_v0  ;;  %v559_v2 = vpop.f32.mrb[7].mxu0  ;;  %834 = vst [vmem:[%s1498_s11 + $0x138] sm:$0xff] %v1530_v1  ;;  %v1535_v3 = vpop.f32.mrb[7].mxu1  ;;  %v935_v10 = vmul.f32 %v1270_v0, %v1270_v0 }
 0x105   : > { %v995_v4 = vadd.f32 %v994_v63, %v932_v62  ;;  %800 = vst [vmem:[%s1498_s11 + $0x28] sm:$0xff] %v559_v2  ;;  %v863_v5 = vadd.f32 %v862_v61, %v559_v2  ;;  %v933_v6 = vmul.f32 %v559_v2, %v559_v2  ;;  %832 = vst [vmem:[%s1498_s11 + $0x128] sm:$0xff] %v1535_v3 }
 0x107   : > { %v864_v8 = vadd.f32 %v1269_v56, %v863_v5  ;;  %v996_v9 = vadd.f32 %v995_v4, %v933_v6 }
 0x109   : > { %v997_v11 = vadd.f32 %v996_v9, %v934_v7  ;;  %v1273_v12 = vpop.f32.mrb[8].mxu0  ;;  %v865_v13 = vadd.f32 %v1270_v0, %v864_v8  ;;  %v1540_v14 = vpop.f32.mrb[8].mxu1 }
 0x10a   : > { %805 = vst [vmem:[%s1498_s11 + $0x50] sm:$0xff] %v1273_v12  ;;  %v572_v15 = vpop.f32.mrb[9].mxu0  ;;  %837 = vst [vmem:[%s1498_s11 + $0x150] sm:$0xff] %v1540_v14  ;;  %v1545_v16 = vpop.f32.mrb[9].mxu1  ;;  %v938_v27 = vmul.f32 %v1273_v12, %v1273_v12 }
 0x10b   : > { %803 = vst [vmem:[%s1498_s11 + $0x40] sm:$0xff] %v572_v15  ;;  %v866_v17 = vadd.f32 %v865_v13, %v572_v15  ;;  %v936_v18 = vmul.f32 %v572_v15, %v572_v15  ;;  %v998_v19 = vadd.f32 %v997_v11, %v935_v10  ;;  %v1274_v20 = vpop.f32.mrb[10].mxu0  ;;  %835 = vst [vmem:[%s1498_s11 + $0x140] sm:$0xff] %v1545_v16  ;;  %v1550_v21 = vpop.f32.mrb[10].mxu1 }
 0x10c   : > { %806 = vst [vmem:[%s1498_s11 + $0x58] sm:$0xff] %v1274_v20  ;;  %v575_v22 = vpop.f32.mrb[11].mxu0  ;;  %838 = vst [vmem:[%s1498_s11 + $0x158] sm:$0xff] %v1550_v21  ;;  %v1555_v23 = vpop.f32.mrb[11].mxu1  ;;  %v939_v30 = vmul.f32 %v1274_v20, %v1274_v20 }
 0x10d   : > { %v999_v24 = vadd.f32 %v998_v19, %v936_v18  ;;  %804 = vst [vmem:[%s1498_s11 + $0x48] sm:$0xff] %v575_v22  ;;  %v867_v25 = vadd.f32 %v866_v17, %v575_v22  ;;  %v937_v26 = vmul.f32 %v575_v22, %v575_v22  ;;  %836 = vst [vmem:[%s1498_s11 + $0x148] sm:$0xff] %v1555_v23 }
 0x10f   : > { %v868_v28 = vadd.f32 %v1273_v12, %v867_v25  ;;  %v1000_v29 = vadd.f32 %v999_v24, %v937_v26 }
 0x111   : > { %v1001_v31 = vadd.f32 %v1000_v29, %v938_v27  ;;  %v1277_v32 = vpop.f32.mrb[12].mxu0  ;;  %v869_v33 = vadd.f32 %v1274_v20, %v868_v28  ;;  %v1560_v34 = vpop.f32.mrb[12].mxu1 }
 0x112   : > { %809 = vst [vmem:[%s1498_s11 + $0x70] sm:$0xff] %v1277_v32  ;;  %v588_v35 = vpop.f32.mrb[13].mxu0  ;;  %841 = vst [vmem:[%s1498_s11 + $0x170] sm:$0xff] %v1560_v34  ;;  %v1565_v36 = vpop.f32.mrb[13].mxu1  ;;  %v942_v51 = vmul.f32 %v1277_v32, %v1277_v32 }
 0x113   : > { %807 = vst [vmem:[%s1498_s11 + $0x60] sm:$0xff] %v588_v35  ;;  %v870_v37 = vadd.f32 %v869_v33, %v588_v35  ;;  %v940_v38 = vmul.f32 %v588_v35, %v588_v35  ;;  %v1002_v39 = vadd.f32 %v1001_v31, %v939_v30  ;;  %v1278_v40 = vpop.f32.mrb[14].mxu0  ;;  %839 = vst [vmem:[%s1498_s11 + $0x160] sm:$0xff] %v1565_v36  ;;  %v1570_v42 = vpop.f32.mrb[14].mxu1 }
 0x114   : > { %810 = vst [vmem:[%s1498_s11 + $0x78] sm:$0xff] %v1278_v40  ;;  %v591_v44 = vpop.f32.mrb[15].mxu0  ;;  %842 = vst [vmem:[%s1498_s11 + $0x178] sm:$0xff] %v1570_v42  ;;  %v1575_v46 = vpop.f32.mrb[15].mxu1  ;;  %v943_v54 = vmul.f32 %v1278_v40, %v1278_v40 }
 0x115   : > { %v1003_v48 = vadd.f32 %v1002_v39, %v940_v38  ;;  %808 = vst [vmem:[%s1498_s11 + $0x68] sm:$0xff] %v591_v44  ;;  %v871_v49 = vadd.f32 %v870_v37, %v591_v44  ;;  %v941_v50 = vmul.f32 %v591_v44, %v591_v44  ;;  %840 = vst [vmem:[%s1498_s11 + $0x168] sm:$0xff] %v1575_v46 }
 0x117   : > { %v872_v52 = vadd.f32 %v1277_v32, %v871_v49  ;;  %v1004_v53 = vadd.f32 %v1003_v48, %v941_v50 }
 0x119   : > { %v1005_v55 = vadd.f32 %v1004_v53, %v942_v51  ;;  %v1281_v56 = vpop.f32.mrb[16].mxu0  ;;  %v873_v57 = vadd.f32 %v1278_v40, %v872_v52  ;;  %v1580_v59 = vpop.f32.mrb[16].mxu1 }
 0x11a   : > { %813 = vst [vmem:[%s1498_s11 + $0x90] sm:$0xff] %v1281_v56  ;;  %v604_v61 = vpop.f32.mrb[17].mxu0  ;;  %845 = vst [vmem:[%s1498_s11 + $0x190] sm:$0xff] %v1580_v59  ;;  %v1585_v62 = vpop.f32.mrb[17].mxu1  ;;  %v946_v11 = vmul.f32 %v1281_v56, %v1281_v56 }
 0x11b   : > { %811 = vst [vmem:[%s1498_s11 + $0x80] sm:$0xff] %v604_v61  ;;  %v874_v63 = vadd.f32 %v873_v57, %v604_v61  ;;  %v944_v0 = vmul.f32 %v604_v61, %v604_v61  ;;  %v1006_v2 = vadd.f32 %v1005_v55, %v943_v54  ;;  %v1282_v4 = vpop.f32.mrb[18].mxu0  ;;  %843 = vst [vmem:[%s1498_s11 + $0x180] sm:$0xff] %v1585_v62  ;;  %v1590_v5 = vpop.f32.mrb[18].mxu1 }
 0x11c   : > { %814 = vst [vmem:[%s1498_s11 + $0x98] sm:$0xff] %v1282_v4  ;;  %v607_v6 = vpop.f32.mrb[19].mxu0  ;;  %846 = vst [vmem:[%s1498_s11 + $0x198] sm:$0xff] %v1590_v5  ;;  %v1595_v7 = vpop.f32.mrb[19].mxu1  ;;  %v947_v15 = vmul.f32 %v1282_v4, %v1282_v4 }
 0x11d   : > { %v1007_v8 = vadd.f32 %v1006_v2, %v944_v0  ;;  %812 = vst [vmem:[%s1498_s11 + $0x88] sm:$0xff] %v607_v6  ;;  %v875_v9 = vadd.f32 %v874_v63, %v607_v6  ;;  %v945_v10 = vmul.f32 %v607_v6, %v607_v6  ;;  %844 = vst [vmem:[%s1498_s11 + $0x188] sm:$0xff] %v1595_v7 }
 0x11f   : > { %v876_v12 = vadd.f32 %v1281_v56, %v875_v9  ;;  %v1008_v13 = vadd.f32 %v1007_v8, %v945_v10 }
 0x121   : > { %v1009_v17 = vadd.f32 %v1008_v13, %v946_v11  ;;  %v1285_v18 = vpop.f32.mrb[20].mxu0  ;;  %v877_v19 = vadd.f32 %v1282_v4, %v876_v12  ;;  %v1600_v20 = vpop.f32.mrb[20].mxu1 }
 0x122   : > { %817 = vst [vmem:[%s1498_s11 + $0xb0] sm:$0xff] %v1285_v18  ;;  %v620_v22 = vpop.f32.mrb[21].mxu0  ;;  %849 = vst [vmem:[%s1498_s11 + $0x1b0] sm:$0xff] %v1600_v20  ;;  %v1605_v24 = vpop.f32.mrb[21].mxu1  ;;  %v950_v37 = vmul.f32 %v1285_v18, %v1285_v18 }
 0x123   : > { %815 = vst [vmem:[%s1498_s11 + $0xa0] sm:$0xff] %v620_v22  ;;  %v878_v25 = vadd.f32 %v877_v19, %v620_v22  ;;  %v948_v26 = vmul.f32 %v620_v22, %v620_v22  ;;  %v1010_v27 = vadd.f32 %v1009_v17, %v947_v15  ;;  %v1286_v28 = vpop.f32.mrb[22].mxu0  ;;  %847 = vst [vmem:[%s1498_s11 + $0x1a0] sm:$0xff] %v1605_v24  ;;  %v1610_v29 = vpop.f32.mrb[22].mxu1 }
 0x124   : > { %818 = vst [vmem:[%s1498_s11 + $0xb8] sm:$0xff] %v1286_v28  ;;  %v623_v30 = vpop.f32.mrb[23].mxu0  ;;  %850 = vst [vmem:[%s1498_s11 + $0x1b8] sm:$0xff] %v1610_v29  ;;  %v1615_v31 = vpop.f32.mrb[23].mxu1  ;;  %v951_v40 = vmul.f32 %v1286_v28, %v1286_v28 }
 0x125   : > { %v1011_v32 = vadd.f32 %v1010_v27, %v948_v26  ;;  %816 = vst [vmem:[%s1498_s11 + $0xa8] sm:$0xff] %v623_v30  ;;  %v879_v33 = vadd.f32 %v878_v25, %v623_v30  ;;  %v949_v35 = vmul.f32 %v623_v30, %v623_v30  ;;  %848 = vst [vmem:[%s1498_s11 + $0x1a8] sm:$0xff] %v1615_v31 }
 0x127   : > { %v880_v38 = vadd.f32 %v1285_v18, %v879_v33  ;;  %v1012_v39 = vadd.f32 %v1011_v32, %v949_v35 }
 0x129   : > { %v1013_v44 = vadd.f32 %v1012_v39, %v950_v37  ;;  %v1289_v48 = vpop.f32.mrb[24].mxu0  ;;  %v881_v49 = vadd.f32 %v1286_v28, %v880_v38  ;;  %v1620_v50 = vpop.f32.mrb[24].mxu1 }
 0x12a   : > { %821 = vst [vmem:[%s1498_s11 + $0xd0] sm:$0xff] %v1289_v48  ;;  %v636_v51 = vpop.f32.mrb[25].mxu0  ;;  %853 = vst [vmem:[%s1498_s11 + $0x1d0] sm:$0xff] %v1620_v50  ;;  %v1625_v52 = vpop.f32.mrb[25].mxu1  ;;  %v954_v6 = vmul.f32 %v1289_v48, %v1289_v48 }
 0x12b   : > { %819 = vst [vmem:[%s1498_s11 + $0xc0] sm:$0xff] %v636_v51  ;;  %v882_v53 = vadd.f32 %v881_v49, %v636_v51  ;;  %v952_v54 = vmul.f32 %v636_v51, %v636_v51  ;;  %v1014_v55 = vadd.f32 %v1013_v44, %v951_v40  ;;  %v1290_v56 = vpop.f32.mrb[26].mxu0  ;;  %851 = vst [vmem:[%s1498_s11 + $0x1c0] sm:$0xff] %v1625_v52  ;;  %v1630_v57 = vpop.f32.mrb[26].mxu1 }
 0x12c   : > { %822 = vst [vmem:[%s1498_s11 + $0xd8] sm:$0xff] %v1290_v56  ;;  %v639_v61 = vpop.f32.mrb[27].mxu0  ;;  %854 = vst [vmem:[%s1498_s11 + $0x1d8] sm:$0xff] %v1630_v57  ;;  %v1635_v63 = vpop.f32.mrb[27].mxu1  ;;  %v955_v10 = vmul.f32 %v1290_v56, %v1290_v56  ;;  %v960_v49 = vmul.f32 %v1505_v43, %v1505_v43 }
 0x12d   : > { %v1015_v0 = vadd.f32 %v1014_v55, %v952_v54  ;;  %820 = vst [vmem:[%s1498_s11 + $0xc8] sm:$0xff] %v639_v61  ;;  %v883_v2 = vadd.f32 %v882_v53, %v639_v61  ;;  %v953_v4 = vmul.f32 %v639_v61, %v639_v61  ;;  %852 = vst [vmem:[%s1498_s11 + $0x1c8] sm:$0xff] %v1635_v63 }
 0x12e   : > { %v962_v61 = vmul.f32 %v1500_v41, %v1500_v41 }
 0x12f   : > { %v884_v8 = vadd.f32 %v1289_v48, %v883_v2  ;;  %v1016_v9 = vadd.f32 %v1015_v0, %v953_v4  ;;  %v963_v4 = vmul.f32 %v1510_v45, %v1510_v45 }
 0x131   : > { %v1017_v11 = vadd.f32 %v1016_v9, %v954_v6  ;;  %v1293_v12 = vpop.f32.mrb[28].mxu0  ;;  %v885_v13 = vadd.f32 %v1290_v56, %v884_v8  ;;  %v1640_v15 = vpop.f32.mrb[28].mxu1  ;;  %v961_v56 = vmul.f32 %v1515_v47, %v1515_v47 }
 0x132   : > { %825 = vst [vmem:[%s1498_s11 + $0xf0] sm:$0xff] %v1293_v12  ;;  %v652_v17 = vpop.f32.mrb[29].mxu0  ;;  %857 = vst [vmem:[%s1498_s11 + $0x1f0] sm:$0xff] %v1640_v15  ;;  %v1645_v18 = vpop.f32.mrb[29].mxu1  ;;  %v958_v37 = vmul.f32 %v1293_v12, %v1293_v12 }
 0x133   : > { %823 = vst [vmem:[%s1498_s11 + $0xe0] sm:$0xff] %v652_v17  ;;  %v886_v19 = vadd.f32 %v885_v13, %v652_v17  ;;  %v956_v22 = vmul.f32 %v652_v17, %v652_v17  ;;  %v1018_v25 = vadd.f32 %v1017_v11, %v955_v10  ;;  %v1294_v26 = vpop.f32.mrb[30].mxu0  ;;  %855 = vst [vmem:[%s1498_s11 + $0x1e0] sm:$0xff] %v1645_v18  ;;  %v1650_v27 = vpop.f32.mrb[30].mxu1 }
 0x134   : > { %826 = vst [vmem:[%s1498_s11 + $0xf8] sm:$0xff] %v1294_v26  ;;  %v655_v28 = vpop.f32.mrb[31].mxu0  ;;  %858 = vst [vmem:[%s1498_s11 + $0x1f8] sm:$0xff] %v1650_v27  ;;  %v1655_v30 = vpop.f32.mrb[31].mxu1  ;;  %v959_v40 = vmul.f32 %v1294_v26, %v1294_v26 }
 0x135   : > { %v1019_v32 = vadd.f32 %v1018_v25, %v956_v22  ;;  %824 = vst [vmem:[%s1498_s11 + $0xe8] sm:$0xff] %v655_v28  ;;  %v887_v33 = vadd.f32 %v886_v19, %v655_v28  ;;  %v957_v35 = vmul.f32 %v655_v28, %v655_v28  ;;  %856 = vst [vmem:[%s1498_s11 + $0x1e8] sm:$0xff] %v1655_v30 }
 0x137   : > { %v888_v38 = vadd.f32 %v1293_v12, %v887_v33  ;;  %v1020_v39 = vadd.f32 %v1019_v32, %v957_v35  ;;  %v965_v12 = vmul.f32 %v1535_v3, %v1535_v3  ;;  %v969_v32 = vmul.f32 %v1555_v23, %v1555_v23 }
 0x139   : > { %v1021_v44 = vadd.f32 %v1020_v39, %v958_v37  ;;  %v889_v48 = vadd.f32 %v1294_v26, %v888_v38 }
 0x13b   : > { %v890_v51 = vadd.f32 %v889_v48, %v1505_v43  ;;  %v1022_v53 = vadd.f32 %v1021_v44, %v959_v40  ;;  %v964_v43 = vmul.f32 %v1525_v60, %v1525_v60  ;;  %v973_v48 = vmul.f32 %v1575_v46, %v1575_v46 }
 0x13d   : > { %v1023_v54 = vadd.f32 %v1022_v53, %v960_v49  ;;  %v891_v55 = vadd.f32 %v890_v51, %v1515_v47 }
 0x13f   : > { %v892_v0 = vadd.f32 %v1500_v41, %v891_v55  ;;  %v1024_v2 = vadd.f32 %v1023_v54, %v961_v56  ;;  %v966_v41 = vmul.f32 %v1520_v58, %v1520_v58 }
 0x141   : > { %v1025_v6 = vadd.f32 %v1024_v2, %v962_v61  ;;  %v893_v8 = vadd.f32 %v1510_v45, %v892_v0  ;;  %v967_v45 = vmul.f32 %v1530_v1, %v1530_v1  ;;  %v977_v0 = vmul.f32 %v1595_v7, %v1595_v7 }
 0x143   : > { %v894_v9 = vadd.f32 %v893_v8, %v1525_v60  ;;  %v1026_v10 = vadd.f32 %v1025_v6, %v963_v4  ;;  %v968_v60 = vmul.f32 %v1545_v16, %v1545_v16 }
 0x145   : > { %v1027_v11 = vadd.f32 %v1026_v10, %v964_v43  ;;  %v895_v47 = vadd.f32 %v894_v9, %v1535_v3 }
 0x147   : > { %v896_v13 = vadd.f32 %v1520_v58, %v895_v47  ;;  %v1028_v17 = vadd.f32 %v1027_v11, %v965_v12  ;;  %v970_v58 = vmul.f32 %v1540_v14, %v1540_v14  ;;  %v981_v11 = vmul.f32 %v1615_v31, %v1615_v31 }
 0x149   : > { %v1029_v19 = vadd.f32 %v1028_v17, %v966_v41  ;;  %v897_v22 = vadd.f32 %v1530_v1, %v896_v13  ;;  %v971_v1 = vmul.f32 %v1550_v21, %v1550_v21 }
 0x14b   : > { %v898_v25 = vadd.f32 %v897_v22, %v1545_v16  ;;  %v1030_v26 = vadd.f32 %v1029_v19, %v967_v45  ;;  %v972_v16 = vmul.f32 %v1565_v36, %v1565_v36  ;;  %v985_v22 = vmul.f32 %v1635_v63, %v1635_v63 }
 0x14d   : > { %v1031_v28 = vadd.f32 %v1030_v26, %v968_v60  ;;  %v899_v3 = vadd.f32 %v898_v25, %v1555_v23 }
 0x14f   : > { %v900_v33 = vadd.f32 %v1540_v14, %v899_v3  ;;  %v1032_v35 = vadd.f32 %v1031_v28, %v969_v32  ;;  %v974_v14 = vmul.f32 %v1560_v34, %v1560_v34  ;;  %v988_v28 = vmul.f32 %v1645_v18, %v1645_v18 }
 0x151   : > { %v1033_v37 = vadd.f32 %v1032_v35, %v970_v58  ;;  %v901_v38 = vadd.f32 %v1550_v21, %v900_v33  ;;  %v975_v21 = vmul.f32 %v1570_v42, %v1570_v42  ;;  %v990_v33 = vmul.f32 %v1640_v15, %v1640_v15 }
 0x153   : > { %v902_v39 = vadd.f32 %v901_v38, %v1565_v36  ;;  %v1034_v40 = vadd.f32 %v1033_v37, %v971_v1  ;;  %v976_v36 = vmul.f32 %v1585_v62, %v1585_v62 }
 0x155   : > { %v1035_v44 = vadd.f32 %v1034_v40, %v972_v16  ;;  %v903_v23 = vadd.f32 %v902_v39, %v1575_v46 }
 0x157   : > { %v904_v49 = vadd.f32 %v1560_v34, %v903_v23  ;;  %v1036_v51 = vadd.f32 %v1035_v44, %v973_v48  ;;  %v978_v34 = vmul.f32 %v1580_v59, %v1580_v59  ;;  %v1061_v44 = vlaneseq }
 0x159   : > { %v1037_v53 = vadd.f32 %v1036_v51, %v974_v14  ;;  %v905_v54 = vadd.f32 %v1570_v42, %v904_v49  ;;  %v979_v42 = vmul.f32 %v1590_v5, %v1590_v5  ;;  %v1062_v49 = vshrl.u32 %v1061_v44, 7 }
 0x15b   : > { %v906_v55 = vadd.f32 %v905_v54, %v1585_v62  ;;  %v1038_v56 = vadd.f32 %v1037_v53, %v975_v21  ;;  %v980_v62 = vmul.f32 %v1605_v24, %v1605_v24  ;;  %vm1064_vm0 = vcmp.eq.s32.totalorder %v1062_v49, 1 }
 0x15c   : > { %vm1063_vm1 = vcmp.eq.s32.totalorder %v1062_v49, 0 }
 0x15d   : > { %v1039_v61 = vadd.f32 %v1038_v56, %v976_v36  ;;  %v907_v46 = vadd.f32 %v906_v55, %v1595_v7 }
 0x15f   : > { %v908_v2 = vadd.f32 %v1580_v59, %v907_v46  ;;  %v1040_v4 = vadd.f32 %v1039_v61, %v977_v0  ;;  %v982_v59 = vmul.f32 %v1600_v20, %v1600_v20 }
 0x161   : > { %v1041_v6 = vadd.f32 %v1040_v4, %v978_v34  ;;  %v909_v8 = vadd.f32 %v1590_v5, %v908_v2  ;;  %v983_v5 = vmul.f32 %v1610_v29, %v1610_v29 }
 0x163   : > { %v910_v43 = vadd.f32 %v909_v8, %v1605_v24  ;;  %v1042_v9 = vadd.f32 %v1041_v6, %v979_v42  ;;  %v984_v24 = vmul.f32 %v1625_v52, %v1625_v52 }
 0x165   : > { %v1043_v10 = vadd.f32 %v1042_v9, %v980_v62  ;;  %v911_v7 = vadd.f32 %v910_v43, %v1615_v31 }
 0x167   : > { %v912_v47 = vadd.f32 %v1600_v20, %v911_v7  ;;  %v1044_v12 = vadd.f32 %v1043_v10, %v981_v11  ;;  %v986_v20 = vmul.f32 %v1620_v50, %v1620_v50 }
 0x169   : > { %v1045_v41 = vadd.f32 %v1044_v12, %v982_v59  ;;  %v913_v13 = vadd.f32 %v1610_v29, %v912_v47  ;;  %v987_v29 = vmul.f32 %v1630_v57, %v1630_v57 }
 0x16b   : > { %v914_v17 = vadd.f32 %v913_v13, %v1625_v52  ;;  %v1046_v45 = vadd.f32 %v1045_v41, %v983_v5 }
 0x16d   : > { %v1047_v19 = vadd.f32 %v1046_v45, %v984_v24  ;;  %v915_v31 = vadd.f32 %v914_v17, %v1635_v63 }
 0x16f   : > { %v916_v60 = vadd.f32 %v1620_v50, %v915_v31  ;;  %v1048_v25 = vadd.f32 %v1047_v19, %v985_v22  ;;  %v989_v50 = vmul.f32 %v1655_v30, %v1655_v30 }
 0x171   : > { %v1049_v26 = vadd.f32 %v1048_v25, %v986_v20  ;;  %v917_v52 = vadd.f32 %v1630_v57, %v916_v60  ;;  %v991_v57 = vmul.f32 %v1650_v27, %v1650_v27 }
 0x173   : > { %v918_v3 = vadd.f32 %v917_v52, %v1645_v18  ;;  %v1050_v32 = vadd.f32 %v1049_v26, %v987_v29 }
 0x175   : > { %v1051_v63 = vadd.f32 %v1050_v32, %v988_v28  ;;  %v919_v58 = vadd.f32 %v918_v3, %v1655_v30 }
 0x177   : > { %v920_v35 = vadd.f32 %v1640_v15, %v919_v58  ;;  %v1052_v1 = vadd.f32 %v1051_v63, %v989_v50 }
 0x179   : > { %v921_v37 = vadd.f32 %v1650_v27, %v920_v35  ;;  %v1053_v18 = vadd.f32 %v1052_v1, %v990_v33 }
 0x17b   : > { %v922_v38 = vrot.slane %v921_v37, 4  ;;  %v1054_v16 = vadd.f32 %v1053_v18, %v991_v57 }
 0x17d   : > { %v923_v39 = vadd.f32 %v922_v38, %v921_v37  ;;  %v1055_v40 = vrot.slane %v1054_v16, 4 }
 0x17f   : > { %v924_v23 = vrot.slane %v923_v39, 2  ;;  %v1056_v30 = vadd.f32 %v1055_v40, %v1054_v16 }
 0x181   : > { %v925_v48 = vadd.f32 %v924_v23, %v923_v39  ;;  %v1057_v14 = vrot.slane %v1056_v30, 2 }
 0x183   : > { %v1058_v15 = vadd.f32 %v1057_v14, %v1056_v30  ;;  %v926_v51 = vrot.slane %v925_v48, 1 }
 0x185   : > { %v1059_v21 = vrot.slane %v1058_v15, 1  ;;  %v927_v27 = vadd.f32 %v926_v51, %v925_v48 }
 0x187   : > { %v1060_v53 = vadd.f32 %v1059_v21, %v1058_v15 }
 0x189   : > { %v1065_v54 = vsel %vm1064_vm0, %v1060_v53, 0.0 }
 0x18a   : > { %v1066_v36 = vsel %vm1063_vm1, %v927_v27, %v1065_v54 }
 0x18b   : > { %1067 = vst [vmem:[%s184_s17] sm:$0xff] %v1066_v36 }
 0x18c PF: > { %s14_s12 = sadd.s32 1, %s1397_s12  }
 0x18d   : > { %p11_p5 = scmp.ge.s32.totalorder %s14_s12, 18  }
 0x18f   :  { %13 = sbr.rel (!%p11_p5) target bundleno = 1 (0x1), region = 70 }

// kernel: basic_block_forward.5
= control target key start
LH: loop header
LB: loop body
LE: loop exit
PB: predicated region body
PF: predicated region fallthrough
CT: control target
= control target key end

     0   :  { %s613_s12 = smov 0   ;;  %s900_s0 = inlined_call_operand.vmem [shape: f32[8192,128], index: 0, kind: input, shape index: {}]   ;;  %s901_s1 = inlined_call_operand.vmem [shape: f32[1,128], index: 1, kind: input, shape index: {}]   ;;  %s902_s2 = inlined_call_operand.vmem [shape: f32[1,128], index: 2, kind: input, shape index: {}]   ;;  %s903_s3 = inlined_call_operand.vmem [shape: f32[8192,128], index: 3, kind: output, shape index: {}]  }
   0x1 LB: > { %s564_s13 = sadd.s32 4294967295, %s591_s12   ;;  %p568_p0 = scmp.ge.s32.totalorder %s591_s12, 1  ;;  %s591_s12 = sphi %s613_s12, %s13_s12  }
   0x2   : > { %p138_p1 = scmp.lt.s32.totalorder %s591_s12, 17 }
   0x4   : > { %p139_p2 = pnand %p568_p0, %p138_p1 }
   0x5   : > { %s569_s14 = sshll.u32 (!%p139_p2), %s564_s13, 6  ;;  %v624_v0 = vld [vmem:[%s901_s1] ss:$0 sm:$0xff] (!%p139_p2) }
   0x6   : > { %142 = sbr.rel (%p139_p2) target bundleno = 70 (0x46), region = 32  ;;  %p163_p3 = scmp.lt.s32.totalorder (!%p139_p2), %s569_s14, 1023  ;;  %v634_v1 = vld [vmem:[%s902_s2] ss:$0 sm:$0xff] (!%p139_p2) }
   0xd   : > { %s905_s14 = smov (!%p163_p3, %s569_s14), 1023 }
   0xe   : > { %s570_s15 = sshll.u32 %s905_s14, 3 }
   0xf   : > { %s629_s20 = scalar_lea.vmem %s900_s0, %s570_s15  ;;  %s657_s25 = scalar_lea.vmem %s903_s3, %s570_s15 }
  0x10   : > { %v174_v2 = vld [vmem:[%s629_s20] sm:$0xff]  ;;  %v175_v3 = vld [vmem:[%s629_s20 + $0x8] sm:$0xff]  ;;  %v176_v4 = vld [vmem:[%s629_s20 + $0x10] sm:$0xff] }
  0x11   : > { %v245_v5 = vmul.f32 %v624_v0, %v174_v2  ;;  %v246_v6 = vmul.f32 %v624_v0, %v175_v3  ;;  %v247_v7 = vmul.f32 %v624_v0, %v176_v4  ;;  %v177_v8 = vld [vmem:[%s629_s20 + $0x18] sm:$0xff]  ;;  %v178_v9 = vld [vmem:[%s629_s20 + $0x20] sm:$0xff]  ;;  %v179_v10 = vld [vmem:[%s629_s20 + $0x28] sm:$0xff] }
  0x12   : > { %v248_v11 = vmul.f32 %v624_v0, %v177_v8  ;;  %v249_v12 = vmul.f32 %v624_v0, %v178_v9  ;;  %v250_v13 = vmul.f32 %v624_v0, %v179_v10  ;;  %v180_v14 = vld [vmem:[%s629_s20 + $0x30] sm:$0xff]  ;;  %v181_v15 = vld [vmem:[%s629_s20 + $0x38] sm:$0xff]  ;;  %v182_v24 = vld [vmem:[%s629_s20 + $0x40] sm:$0xff] }
  0x13   : > { %v316_v16 = vadd.f32 %v634_v1, %v245_v5  ;;  %v317_v17 = vadd.f32 %v634_v1, %v246_v6  ;;  %v318_v18 = vadd.f32 %v634_v1, %v247_v7  ;;  %v251_v19 = vmul.f32 %v624_v0, %v180_v14  ;;  %v183_v25 = vld [vmem:[%s629_s20 + $0x48] sm:$0xff]  ;;  %v184_v26 = vld [vmem:[%s629_s20 + $0x50] sm:$0xff]  ;;  %v185_v31 = vld [vmem:[%s629_s20 + $0x58] sm:$0xff] }
  0x14   : > { %v319_v20 = vadd.f32 %v634_v1, %v248_v11  ;;  %v320_v21 = vadd.f32 %v634_v1, %v249_v12  ;;  %v321_v22 = vadd.f32 %v634_v1, %v250_v13  ;;  %v252_v23 = vmul.f32 %v624_v0, %v181_v15  ;;  %v186_v32 = vld [vmem:[%s629_s20 + $0x60] sm:$0xff]  ;;  %v187_v33 = vld [vmem:[%s629_s20 + $0x68] sm:$0xff]  ;;  %v188_v38 = vld [vmem:[%s629_s20 + $0x70] sm:$0xff] }
  0x15   : > { %v380_v27 = vmax.f32 %v316_v16, 0.0  ;;  %v381_v28 = vmax.f32 %v317_v17, 0.0  ;;  %v382_v29 = vmax.f32 %v318_v18, 0.0  ;;  %v322_v30 = vadd.f32 %v634_v1, %v251_v19  ;;  %v189_v43 = vld [vmem:[%s629_s20 + $0x78] sm:$0xff]  ;;  %v190_v56 = vld [vmem:[%s629_s20 + $0x80] sm:$0xff]  ;;  %v191_v57 = vld [vmem:[%s629_s20 + $0x88] sm:$0xff] }
  0x16   : > { %v383_v34 = vmax.f32 %v319_v20, 0.0  ;;  %v384_v35 = vmax.f32 %v320_v21, 0.0  ;;  %v385_v36 = vmax.f32 %v321_v22, 0.0  ;;  %v323_v37 = vadd.f32 %v634_v1, %v252_v23  ;;  %v192_v58 = vld [vmem:[%s629_s20 + $0x90] sm:$0xff]  ;;  %v193_v63 = vld [vmem:[%s629_s20 + $0x98] sm:$0xff]  ;;  %v194_v2 = vld [vmem:[%s629_s20 + $0xa0] sm:$0xff] }
  0x17   : > { %444 = vst [vmem:[%s657_s25] sm:$0xff] %v380_v27  ;;  %445 = vst [vmem:[%s657_s25 + $0x8] sm:$0xff] %v381_v28  ;;  %v386_v39 = vmax.f32 %v322_v30, 0.0  ;;  %v253_v40 = vmul.f32 %v624_v0, %v182_v24  ;;  %v254_v41 = vmul.f32 %v624_v0, %v183_v25  ;;  %v255_v42 = vmul.f32 %v624_v0, %v184_v26  ;;  %v195_v3 = vld [vmem:[%s629_s20 + $0xa8] sm:$0xff]  ;;  %v196_v8 = vld [vmem:[%s629_s20 + $0xb0] sm:$0xff] }
  0x18   : > { %446 = vst [vmem:[%s657_s25 + $0x10] sm:$0xff] %v382_v29  ;;  %447 = vst [vmem:[%s657_s25 + $0x18] sm:$0xff] %v383_v34  ;;  %v387_v44 = vmax.f32 %v323_v37, 0.0  ;;  %v256_v45 = vmul.f32 %v624_v0, %v185_v31  ;;  %v257_v46 = vmul.f32 %v624_v0, %v186_v32  ;;  %v258_v47 = vmul.f32 %v624_v0, %v187_v33  ;;  %v197_v13 = vld [vmem:[%s629_s20 + $0xb8] sm:$0xff]  ;;  %v198_v26 = vld [vmem:[%s629_s20 + $0xc0] sm:$0xff] }
  0x19   : > { %448 = vst [vmem:[%s657_s25 + $0x20] sm:$0xff] %v384_v35  ;;  %449 = vst [vmem:[%s657_s25 + $0x28] sm:$0xff] %v385_v36  ;;  %v324_v48 = vadd.f32 %v634_v1, %v253_v40  ;;  %v325_v49 = vadd.f32 %v634_v1, %v254_v41  ;;  %v326_v50 = vadd.f32 %v634_v1, %v255_v42  ;;  %v199_v27 = vld [vmem:[%s629_s20 + $0xc8] sm:$0xff]  ;;  %v200_v28 = vld [vmem:[%s629_s20 + $0xd0] sm:$0xff] }
  0x1a   : > { %450 = vst [vmem:[%s657_s25 + $0x30] sm:$0xff] %v386_v39  ;;  %v259_v51 = vmul.f32 %v624_v0, %v188_v38  ;;  %451 = vst [vmem:[%s657_s25 + $0x38] sm:$0xff] %v387_v44  ;;  %v327_v52 = vadd.f32 %v634_v1, %v256_v45  ;;  %v328_v53 = vadd.f32 %v634_v1, %v257_v46  ;;  %v201_v33 = vld [vmem:[%s629_s20 + $0xd8] sm:$0xff]  ;;  %v202_v34 = vld [vmem:[%s629_s20 + $0xe0] sm:$0xff] }
  0x1b   : > { %v329_v54 = vadd.f32 %v634_v1, %v258_v47  ;;  %v260_v55 = vmul.f32 %v624_v0, %v189_v43  ;;  %v388_v59 = vmax.f32 %v324_v48, 0.0  ;;  %v389_v60 = vmax.f32 %v325_v49, 0.0  ;;  %v203_v35 = vld [vmem:[%s629_s20 + $0xe8] sm:$0xff]  ;;  %v204_v40 = vld [vmem:[%s629_s20 + $0xf0] sm:$0xff]  ;;  %v205_v45 = vld [vmem:[%s629_s20 + $0xf8] sm:$0xff] }
  0x1c   : > { %v390_v61 = vmax.f32 %v326_v50, 0.0  ;;  %v330_v62 = vadd.f32 %v634_v1, %v259_v51  ;;  %v391_v4 = vmax.f32 %v327_v52, 0.0  ;;  %v392_v5 = vmax.f32 %v328_v53, 0.0 }
  0x1d   : > { %v393_v6 = vmax.f32 %v329_v54, 0.0  ;;  %v331_v7 = vadd.f32 %v634_v1, %v260_v55  ;;  %452 = vst [vmem:[%s657_s25 + $0x40] sm:$0xff] %v388_v59  ;;  %453 = vst [vmem:[%s657_s25 + $0x48] sm:$0xff] %v389_v60  ;;  %v261_v10 = vmul.f32 %v624_v0, %v190_v56  ;;  %v262_v11 = vmul.f32 %v624_v0, %v191_v57  ;;  %v207_v59 = vld [vmem:[%s629_s20 + $0x108] sm:$0xff]  ;;  %v208_v60 = vld [vmem:[%s629_s20 + $0x110] sm:$0xff] }
  0x1e   : > { %454 = vst [vmem:[%s657_s25 + $0x50] sm:$0xff] %v390_v61  ;;  %v394_v9 = vmax.f32 %v330_v62, 0.0  ;;  %v263_v12 = vmul.f32 %v624_v0, %v192_v58  ;;  %455 = vst [vmem:[%s657_s25 + $0x58] sm:$0xff] %v391_v4  ;;  %v264_v15 = vmul.f32 %v624_v0, %v193_v63  ;;  %v265_v16 = vmul.f32 %v624_v0, %v194_v2  ;;  %v206_v58 = vld [vmem:[%s629_s20 + $0x100] sm:$0xff] }
  0x1f   : > { %456 = vst [vmem:[%s657_s25 + $0x60] sm:$0xff] %v392_v5  ;;  %457 = vst [vmem:[%s657_s25 + $0x68] sm:$0xff] %v393_v6  ;;  %v395_v14 = vmax.f32 %v331_v7, 0.0  ;;  %v266_v17 = vmul.f32 %v624_v0, %v195_v3  ;;  %v332_v18 = vadd.f32 %v634_v1, %v261_v10  ;;  %v333_v19 = vadd.f32 %v634_v1, %v262_v11  ;;  %v209_v3 = vld [vmem:[%s629_s20 + $0x118] sm:$0xff]  ;;  %v210_v4 = vld [vmem:[%s629_s20 + $0x120] sm:$0xff] }
  0x20   : > { %458 = vst [vmem:[%s657_s25 + $0x70] sm:$0xff] %v394_v9  ;;  %v334_v20 = vadd.f32 %v634_v1, %v263_v12  ;;  %v267_v21 = vmul.f32 %v624_v0, %v196_v8  ;;  %v335_v22 = vadd.f32 %v634_v1, %v264_v15  ;;  %v336_v23 = vadd.f32 %v634_v1, %v265_v16  ;;  %v211_v5 = vld [vmem:[%s629_s20 + $0x128] sm:$0xff]  ;;  %v212_v10 = vld [vmem:[%s629_s20 + $0x130] sm:$0xff]  ;;  %v213_v15 = vld [vmem:[%s629_s20 + $0x138] sm:$0xff] }
  0x21   : > { %459 = vst [vmem:[%s657_s25 + $0x78] sm:$0xff] %v395_v14  ;;  %v337_v24 = vadd.f32 %v634_v1, %v266_v17  ;;  %v268_v25 = vmul.f32 %v624_v0, %v197_v13  ;;  %v396_v29 = vmax.f32 %v332_v18, 0.0  ;;  %v397_v30 = vmax.f32 %v333_v19, 0.0 }
  0x22   : > { %v398_v31 = vmax.f32 %v334_v20, 0.0  ;;  %v338_v32 = vadd.f32 %v634_v1, %v267_v21  ;;  %v399_v36 = vmax.f32 %v335_v22, 0.0  ;;  %v400_v37 = vmax.f32 %v336_v23, 0.0 }
  0x23   : > { %v401_v38 = vmax.f32 %v337_v24, 0.0  ;;  %v339_v39 = vadd.f32 %v634_v1, %v268_v25  ;;  %460 = vst [vmem:[%s657_s25 + $0x80] sm:$0xff] %v396_v29  ;;  %461 = vst [vmem:[%s657_s25 + $0x88] sm:$0xff] %v397_v30  ;;  %v269_v42 = vmul.f32 %v624_v0, %v198_v26  ;;  %v270_v43 = vmul.f32 %v624_v0, %v199_v27  ;;  %v215_v29 = vld [vmem:[%s629_s20 + $0x148] sm:$0xff]  ;;  %v216_v30 = vld [vmem:[%s629_s20 + $0x150] sm:$0xff] }
  0x24   : > { %462 = vst [vmem:[%s657_s25 + $0x90] sm:$0xff] %v398_v31  ;;  %v402_v41 = vmax.f32 %v338_v32, 0.0  ;;  %v271_v44 = vmul.f32 %v624_v0, %v200_v28  ;;  %463 = vst [vmem:[%s657_s25 + $0x98] sm:$0xff] %v399_v36  ;;  %v272_v47 = vmul.f32 %v624_v0, %v201_v33  ;;  %v273_v48 = vmul.f32 %v624_v0, %v202_v34  ;;  %v214_v28 = vld [vmem:[%s629_s20 + $0x140] sm:$0xff] }
  0x25   : > { %464 = vst [vmem:[%s657_s25 + $0xa0] sm:$0xff] %v400_v37  ;;  %465 = vst [vmem:[%s657_s25 + $0xa8] sm:$0xff] %v401_v38  ;;  %v403_v46 = vmax.f32 %v339_v39, 0.0  ;;  %v274_v49 = vmul.f32 %v624_v0, %v203_v35  ;;  %v340_v50 = vadd.f32 %v634_v1, %v269_v42  ;;  %v341_v51 = vadd.f32 %v634_v1, %v270_v43  ;;  %v217_v35 = vld [vmem:[%s629_s20 + $0x158] sm:$0xff]  ;;  %v218_v36 = vld [vmem:[%s629_s20 + $0x160] sm:$0xff] }
  0x26   : > { %466 = vst [vmem:[%s657_s25 + $0xb0] sm:$0xff] %v402_v41  ;;  %v342_v52 = vadd.f32 %v634_v1, %v271_v44  ;;  %v275_v53 = vmul.f32 %v624_v0, %v204_v40  ;;  %v343_v54 = vadd.f32 %v634_v1, %v272_v47  ;;  %v344_v55 = vadd.f32 %v634_v1, %v273_v48  ;;  %v219_v37 = vld [vmem:[%s629_s20 + $0x168] sm:$0xff]  ;;  %v220_v42 = vld [vmem:[%s629_s20 + $0x170] sm:$0xff]  ;;  %v221_v47 = vld [vmem:[%s629_s20 + $0x178] sm:$0xff] }
  0x27   : > { %467 = vst [vmem:[%s657_s25 + $0xb8] sm:$0xff] %v403_v46  ;;  %v345_v56 = vadd.f32 %v634_v1, %v274_v49  ;;  %v276_v57 = vmul.f32 %v624_v0, %v205_v45  ;;  %v404_v61 = vmax.f32 %v340_v50, 0.0  ;;  %v405_v62 = vmax.f32 %v341_v51, 0.0 }
  0x28   : > { %v406_v63 = vmax.f32 %v342_v52, 0.0  ;;  %v346_v2 = vadd.f32 %v634_v1, %v275_v53  ;;  %v407_v6 = vmax.f32 %v343_v54, 0.0  ;;  %v408_v7 = vmax.f32 %v344_v55, 0.0 }
  0x29   : > { %v409_v8 = vmax.f32 %v345_v56, 0.0  ;;  %v347_v9 = vadd.f32 %v634_v1, %v276_v57  ;;  %468 = vst [vmem:[%s657_s25 + $0xc0] sm:$0xff] %v404_v61  ;;  %469 = vst [vmem:[%s657_s25 + $0xc8] sm:$0xff] %v405_v62  ;;  %v277_v12 = vmul.f32 %v624_v0, %v206_v58  ;;  %v278_v13 = vmul.f32 %v624_v0, %v207_v59  ;;  %v223_v61 = vld [vmem:[%s629_s20 + $0x188] sm:$0xff]  ;;  %v224_v62 = vld [vmem:[%s629_s20 + $0x190] sm:$0xff] }
  0x2a   : > { %470 = vst [vmem:[%s657_s25 + $0xd0] sm:$0xff] %v406_v63  ;;  %v410_v11 = vmax.f32 %v346_v2, 0.0  ;;  %v279_v14 = vmul.f32 %v624_v0, %v208_v60  ;;  %471 = vst [vmem:[%s657_s25 + $0xd8] sm:$0xff] %v407_v6  ;;  %v280_v17 = vmul.f32 %v624_v0, %v209_v3  ;;  %v281_v18 = vmul.f32 %v624_v0, %v210_v4  ;;  %v222_v60 = vld [vmem:[%s629_s20 + $0x180] sm:$0xff] }
  0x2b   : > { %472 = vst [vmem:[%s657_s25 + $0xe0] sm:$0xff] %v408_v7  ;;  %473 = vst [vmem:[%s657_s25 + $0xe8] sm:$0xff] %v409_v8  ;;  %v411_v16 = vmax.f32 %v347_v9, 0.0  ;;  %v282_v19 = vmul.f32 %v624_v0, %v211_v5  ;;  %v348_v20 = vadd.f32 %v634_v1, %v277_v12  ;;  %v349_v21 = vadd.f32 %v634_v1, %v278_v13  ;;  %v225_v5 = vld [vmem:[%s629_s20 + $0x198] sm:$0xff]  ;;  %v226_v6 = vld [vmem:[%s629_s20 + $0x1a0] sm:$0xff] }
  0x2c   : > { %474 = vst [vmem:[%s657_s25 + $0xf0] sm:$0xff] %v410_v11  ;;  %v350_v22 = vadd.f32 %v634_v1, %v279_v14  ;;  %v283_v23 = vmul.f32 %v624_v0, %v212_v10  ;;  %v351_v24 = vadd.f32 %v634_v1, %v280_v17  ;;  %v352_v25 = vadd.f32 %v634_v1, %v281_v18  ;;  %v227_v7 = vld [vmem:[%s629_s20 + $0x1a8] sm:$0xff]  ;;  %v228_v12 = vld [vmem:[%s629_s20 + $0x1b0] sm:$0xff]  ;;  %v229_v17 = vld [vmem:[%s629_s20 + $0x1b8] sm:$0xff] }
  0x2d   : > { %475 = vst [vmem:[%s657_s25 + $0xf8] sm:$0xff] %v411_v16  ;;  %v353_v26 = vadd.f32 %v634_v1, %v282_v19  ;;  %v284_v27 = vmul.f32 %v624_v0, %v213_v15  ;;  %v412_v31 = vmax.f32 %v348_v20, 0.0  ;;  %v413_v32 = vmax.f32 %v349_v21, 0.0 }
  0x2e   : > { %v414_v33 = vmax.f32 %v350_v22, 0.0  ;;  %v354_v34 = vadd.f32 %v634_v1, %v283_v23  ;;  %v415_v38 = vmax.f32 %v351_v24, 0.0  ;;  %v416_v39 = vmax.f32 %v352_v25, 0.0 }
  0x2f   : > { %v417_v40 = vmax.f32 %v353_v26, 0.0  ;;  %v355_v41 = vadd.f32 %v634_v1, %v284_v27  ;;  %476 = vst [vmem:[%s657_s25 + $0x100] sm:$0xff] %v412_v31  ;;  %477 = vst [vmem:[%s657_s25 + $0x108] sm:$0xff] %v413_v32  ;;  %v285_v44 = vmul.f32 %v624_v0, %v214_v28  ;;  %v286_v45 = vmul.f32 %v624_v0, %v215_v29  ;;  %v231_v31 = vld [vmem:[%s629_s20 + $0x1c8] sm:$0xff]  ;;  %v232_v32 = vld [vmem:[%s629_s20 + $0x1d0] sm:$0xff] }
  0x30   : > { %478 = vst [vmem:[%s657_s25 + $0x110] sm:$0xff] %v414_v33  ;;  %v418_v43 = vmax.f32 %v354_v34, 0.0  ;;  %v287_v46 = vmul.f32 %v624_v0, %v216_v30  ;;  %479 = vst [vmem:[%s657_s25 + $0x118] sm:$0xff] %v415_v38  ;;  %v288_v49 = vmul.f32 %v624_v0, %v217_v35  ;;  %v289_v50 = vmul.f32 %v624_v0, %v218_v36  ;;  %v230_v30 = vld [vmem:[%s629_s20 + $0x1c0] sm:$0xff] }
  0x31   : > { %480 = vst [vmem:[%s657_s25 + $0x120] sm:$0xff] %v416_v39  ;;  %481 = vst [vmem:[%s657_s25 + $0x128] sm:$0xff] %v417_v40  ;;  %v419_v48 = vmax.f32 %v355_v41, 0.0  ;;  %v290_v51 = vmul.f32 %v624_v0, %v219_v37  ;;  %v356_v52 = vadd.f32 %v634_v1, %v285_v44  ;;  %v357_v53 = vadd.f32 %v634_v1, %v286_v45  ;;  %v233_v37 = vld [vmem:[%s629_s20 + $0x1d8] sm:$0xff]  ;;  %v234_v38 = vld [vmem:[%s629_s20 + $0x1e0] sm:$0xff] }
  0x32   : > { %482 = vst [vmem:[%s657_s25 + $0x130] sm:$0xff] %v418_v43  ;;  %v358_v54 = vadd.f32 %v634_v1, %v287_v46  ;;  %v291_v55 = vmul.f32 %v624_v0, %v220_v42  ;;  %v359_v56 = vadd.f32 %v634_v1, %v288_v49  ;;  %v360_v57 = vadd.f32 %v634_v1, %v289_v50  ;;  %v235_v39 = vld [vmem:[%s629_s20 + $0x1e8] sm:$0xff]  ;;  %v236_v44 = vld [vmem:[%s629_s20 + $0x1f0] sm:$0xff]  ;;  %v237_v49 = vld [vmem:[%s629_s20 + $0x1f8] sm:$0xff] }
  0x33   : > { %483 = vst [vmem:[%s657_s25 + $0x138] sm:$0xff] %v419_v48  ;;  %v361_v58 = vadd.f32 %v634_v1, %v290_v51  ;;  %v292_v59 = vmul.f32 %v624_v0, %v221_v47  ;;  %v420_v63 = vmax.f32 %v356_v52, 0.0  ;;  %v421_v2 = vmax.f32 %v357_v53, 0.0 }
  0x34   : > { %v422_v3 = vmax.f32 %v358_v54, 0.0  ;;  %v362_v4 = vadd.f32 %v634_v1, %v291_v55  ;;  %v423_v8 = vmax.f32 %v359_v56, 0.0  ;;  %v424_v9 = vmax.f32 %v360_v57, 0.0 }
  0x35   : > { %v425_v10 = vmax.f32 %v361_v58, 0.0  ;;  %v363_v11 = vadd.f32 %v634_v1, %v292_v59  ;;  %484 = vst [vmem:[%s657_s25 + $0x140] sm:$0xff] %v420_v63  ;;  %485 = vst [vmem:[%s657_s25 + $0x148] sm:$0xff] %v421_v2  ;;  %v293_v14 = vmul.f32 %v624_v0, %v222_v60  ;;  %v294_v15 = vmul.f32 %v624_v0, %v223_v61 }
  0x36   : > { %486 = vst [vmem:[%s657_s25 + $0x150] sm:$0xff] %v422_v3  ;;  %v426_v13 = vmax.f32 %v362_v4, 0.0  ;;  %v295_v16 = vmul.f32 %v624_v0, %v224_v62  ;;  %487 = vst [vmem:[%s657_s25 + $0x158] sm:$0xff] %v423_v8  ;;  %v296_v19 = vmul.f32 %v624_v0, %v225_v5  ;;  %v297_v20 = vmul.f32 %v624_v0, %v226_v6 }
  0x37   : > { %488 = vst [vmem:[%s657_s25 + $0x160] sm:$0xff] %v424_v9  ;;  %489 = vst [vmem:[%s657_s25 + $0x168] sm:$0xff] %v425_v10  ;;  %v427_v18 = vmax.f32 %v363_v11, 0.0  ;;  %v298_v21 = vmul.f32 %v624_v0, %v227_v7  ;;  %v364_v22 = vadd.f32 %v634_v1, %v293_v14  ;;  %v365_v23 = vadd.f32 %v634_v1, %v294_v15 }
  0x38   : > { %490 = vst [vmem:[%s657_s25 + $0x170] sm:$0xff] %v426_v13  ;;  %v366_v24 = vadd.f32 %v634_v1, %v295_v16  ;;  %v299_v25 = vmul.f32 %v624_v0, %v228_v12  ;;  %v367_v26 = vadd.f32 %v634_v1, %v296_v19  ;;  %v368_v27 = vadd.f32 %v634_v1, %v297_v20 }
  0x39   : > { %491 = vst [vmem:[%s657_s25 + $0x178] sm:$0xff] %v427_v18  ;;  %v369_v28 = vadd.f32 %v634_v1, %v298_v21  ;;  %v300_v29 = vmul.f32 %v624_v0, %v229_v17  ;;  %v428_v33 = vmax.f32 %v364_v22, 0.0  ;;  %v429_v34 = vmax.f32 %v365_v23, 0.0 }
  0x3a   : > { %v430_v35 = vmax.f32 %v366_v24, 0.0  ;;  %v370_v36 = vadd.f32 %v634_v1, %v299_v25  ;;  %v431_v40 = vmax.f32 %v367_v26, 0.0  ;;  %v432_v41 = vmax.f32 %v368_v27, 0.0 }
  0x3b   : > { %v433_v42 = vmax.f32 %v369_v28, 0.0  ;;  %v371_v43 = vadd.f32 %v634_v1, %v300_v29  ;;  %492 = vst [vmem:[%s657_s25 + $0x180] sm:$0xff] %v428_v33  ;;  %493 = vst [vmem:[%s657_s25 + $0x188] sm:$0xff] %v429_v34  ;;  %v301_v46 = vmul.f32 %v624_v0, %v230_v30  ;;  %v302_v47 = vmul.f32 %v624_v0, %v231_v31 }
  0x3c   : > { %494 = vst [vmem:[%s657_s25 + $0x190] sm:$0xff] %v430_v35  ;;  %v434_v45 = vmax.f32 %v370_v36, 0.0  ;;  %v303_v48 = vmul.f32 %v624_v0, %v232_v32  ;;  %495 = vst [vmem:[%s657_s25 + $0x198] sm:$0xff] %v431_v40  ;;  %v304_v51 = vmul.f32 %v624_v0, %v233_v37  ;;  %v305_v52 = vmul.f32 %v624_v0, %v234_v38 }
  0x3d   : > { %496 = vst [vmem:[%s657_s25 + $0x1a0] sm:$0xff] %v432_v41  ;;  %497 = vst [vmem:[%s657_s25 + $0x1a8] sm:$0xff] %v433_v42  ;;  %v435_v50 = vmax.f32 %v371_v43, 0.0  ;;  %v306_v53 = vmul.f32 %v624_v0, %v235_v39  ;;  %v372_v54 = vadd.f32 %v634_v1, %v301_v46  ;;  %v373_v55 = vadd.f32 %v634_v1, %v302_v47 }
  0x3e   : > { %498 = vst [vmem:[%s657_s25 + $0x1b0] sm:$0xff] %v434_v45  ;;  %v374_v56 = vadd.f32 %v634_v1, %v303_v48  ;;  %v307_v57 = vmul.f32 %v624_v0, %v236_v44  ;;  %v375_v58 = vadd.f32 %v634_v1, %v304_v51  ;;  %v376_v59 = vadd.f32 %v634_v1, %v305_v52 }
  0x3f   : > { %499 = vst [vmem:[%s657_s25 + $0x1b8] sm:$0xff] %v435_v50  ;;  %v377_v60 = vadd.f32 %v634_v1, %v306_v53  ;;  %v308_v61 = vmul.f32 %v624_v0, %v237_v49  ;;  %v436_v62 = vmax.f32 %v372_v54, 0.0  ;;  %v437_v63 = vmax.f32 %v373_v55, 0.0 }
  0x40   : > { %v438_v2 = vmax.f32 %v374_v56, 0.0  ;;  %v378_v3 = vadd.f32 %v634_v1, %v307_v57  ;;  %v439_v4 = vmax.f32 %v375_v58, 0.0  ;;  %v440_v5 = vmax.f32 %v376_v59, 0.0 }
  0x41   : > { %v441_v6 = vmax.f32 %v377_v60, 0.0  ;;  %v379_v7 = vadd.f32 %v634_v1, %v308_v61  ;;  %500 = vst [vmem:[%s657_s25 + $0x1c0] sm:$0xff] %v436_v62  ;;  %501 = vst [vmem:[%s657_s25 + $0x1c8] sm:$0xff] %v437_v63 }
  0x42   : > { %502 = vst [vmem:[%s657_s25 + $0x1d0] sm:$0xff] %v438_v2  ;;  %v442_v8 = vmax.f32 %v378_v3, 0.0  ;;  %503 = vst [vmem:[%s657_s25 + $0x1d8] sm:$0xff] %v439_v4 }
  0x43   : > { %504 = vst [vmem:[%s657_s25 + $0x1e0] sm:$0xff] %v440_v5  ;;  %505 = vst [vmem:[%s657_s25 + $0x1e8] sm:$0xff] %v441_v6  ;;  %v443_v0 = vmax.f32 %v379_v7, 0.0 }
  0x44   : > { %506 = vst [vmem:[%s657_s25 + $0x1f0] sm:$0xff] %v442_v8 }
  0x45   : > { %507 = vst [vmem:[%s657_s25 + $0x1f8] sm:$0xff] %v443_v0 }
  0x46 PF: > { %s13_s12 = sadd.s32 1, %s591_s12  }
  0x47   : > { %p10_p4 = scmp.ge.s32.totalorder %s13_s12, 18  }
  0x49   :  { %12 = sbr.rel (!%p10_p4) target bundleno = 1 (0x1), region = 62 }

// kernel: basic_block_forward.7
= control target key start
LH: loop header
LB: loop body
LE: loop exit
PB: predicated region body
PF: predicated region fallthrough
CT: control target
= control target key end

     0   :  { %s809_s15 = smov 0   ;;  %s1170_s0 = inlined_call_operand.vmem [shape: f32[8192,128], index: 0, kind: input, shape index: {}]   ;;  %s1171_s1 = inlined_call_operand.vmem [shape: f32[1,128], index: 1, kind: input, shape index: {}]   ;;  %s1172_s2 = inlined_call_operand.vmem [shape: f32[1,128], index: 2, kind: input, shape index: {}]   ;;  %s1173_s3 = inlined_call_operand.vmem [shape: f32[8192,128], index: 3, kind: input, shape index: {}]   ;;  %s1174_s4 = inlined_call_operand.vmem [shape: f32[8192,128], index: 4, kind: output, shape index: {}]  }
   0x1 LB: > { %s753_s16 = sadd.s32 4294967295, %s782_s15   ;;  %p757_p0 = scmp.ge.s32.totalorder %s782_s15, 1  ;;  %s782_s15 = sphi %s809_s15, %s14_s15  }
   0x2   : > { %p174_p1 = scmp.lt.s32.totalorder %s782_s15, 17 }
   0x4   : > { %p175_p2 = pnand %p757_p0, %p174_p1 }
   0x5   : > { %s758_s17 = sshll.u32 (!%p175_p2), %s753_s16, 6  ;;  %v822_v0 = vld [vmem:[%s1171_s1] ss:$0 sm:$0xff] (!%p175_p2) }
   0x6   : > { %178 = sbr.rel (%p175_p2) target bundleno = 87 (0x57), region = 36  ;;  %p206_p3 = scmp.lt.s32.totalorder (!%p175_p2), %s758_s17, 1023  ;;  %v840_v2 = vld [vmem:[%s1172_s2] ss:$0 sm:$0xff] (!%p175_p2) }
   0xd   : > { %s1176_s17 = smov (!%p206_p3, %s758_s17), 1023 }
   0xe   : > { %s817_s18 = sshll.u32 %s1176_s17, 3 }
   0xf   : > { %s828_s23 = scalar_lea.vmem %s1170_s0, %s817_s18  ;;  %s834_s26 = scalar_lea.vmem %s1173_s3, %s817_s18 }
  0x10   : > { %v223_v1 = vld [vmem:[%s828_s23] sm:$0xff]  ;;  %v224_v3 = vld [vmem:[%s828_s23 + $0x8] sm:$0xff]  ;;  %v225_v7 = vld [vmem:[%s828_s23 + $0x10] sm:$0xff]  ;;  %s870_s5 = scalar_lea.vmem %s1174_s4, %s817_s18 }
  0x11   : > { %v294_v4 = vmul.f32 %v822_v0, %v223_v1  ;;  %v429_v5 = vld [vmem:[%s834_s26] sm:$0xff]  ;;  %v295_v6 = vmul.f32 %v822_v0, %v224_v3  ;;  %v430_v8 = vld [vmem:[%s834_s26 + $0x8] sm:$0xff]  ;;  %v296_v9 = vmul.f32 %v822_v0, %v225_v7  ;;  %v226_v10 = vld [vmem:[%s828_s23 + $0x18] sm:$0xff] }
  0x12   : > { %v227_v11 = vld [vmem:[%s828_s23 + $0x20] sm:$0xff]  ;;  %v431_v14 = vld [vmem:[%s834_s26 + $0x10] sm:$0xff]  ;;  %v297_v15 = vmul.f32 %v822_v0, %v226_v10  ;;  %v432_v16 = vld [vmem:[%s834_s26 + $0x18] sm:$0xff] }
  0x13   : > { %v365_v12 = vadd.f32 %v840_v2, %v294_v4  ;;  %v366_v13 = vadd.f32 %v840_v2, %v295_v6  ;;  %v298_v17 = vmul.f32 %v822_v0, %v227_v11  ;;  %v228_v18 = vld [vmem:[%s828_s23 + $0x28] sm:$0xff]  ;;  %v367_v19 = vadd.f32 %v840_v2, %v296_v9  ;;  %v433_v20 = vld [vmem:[%s834_s26 + $0x20] sm:$0xff]  ;;  %v229_v22 = vld [vmem:[%s828_s23 + $0x30] sm:$0xff] }
  0x14   : > { %v299_v21 = vmul.f32 %v822_v0, %v228_v18  ;;  %v230_v23 = vld [vmem:[%s828_s23 + $0x38] sm:$0xff]  ;;  %v368_v26 = vadd.f32 %v840_v2, %v297_v15  ;;  %v434_v28 = vld [vmem:[%s834_s26 + $0x28] sm:$0xff]  ;;  %v300_v31 = vmul.f32 %v822_v0, %v229_v22  ;;  %v231_v33 = vld [vmem:[%s828_s23 + $0x40] sm:$0xff] }
  0x15   : > { %v493_v24 = vadd.f32 %v429_v5, %v365_v12  ;;  %v494_v25 = vadd.f32 %v430_v8, %v366_v13  ;;  %v369_v27 = vadd.f32 %v840_v2, %v298_v17  ;;  %v495_v29 = vadd.f32 %v431_v14, %v367_v19  ;;  %v232_v34 = vld [vmem:[%s828_s23 + $0x48] sm:$0xff]  ;;  %v435_v39 = vld [vmem:[%s834_s26 + $0x30] sm:$0xff]  ;;  %v436_v40 = vld [vmem:[%s834_s26 + $0x38] sm:$0xff] }
  0x16   : > { %v370_v30 = vadd.f32 %v840_v2, %v299_v21  ;;  %v301_v32 = vmul.f32 %v822_v0, %v230_v23  ;;  %v496_v37 = vadd.f32 %v432_v16, %v368_v26  ;;  %v233_v41 = vld [vmem:[%s828_s23 + $0x50] sm:$0xff]  ;;  %v371_v44 = vadd.f32 %v840_v2, %v300_v31  ;;  %v234_v46 = vld [vmem:[%s828_s23 + $0x58] sm:$0xff]  ;;  %v235_v47 = vld [vmem:[%s828_s23 + $0x60] sm:$0xff] }
  0x17   : > { %v557_v35 = vmax.f32 %v493_v24, 0.0  ;;  %v558_v36 = vmax.f32 %v494_v25, 0.0  ;;  %v497_v38 = vadd.f32 %v433_v20, %v369_v27  ;;  %v559_v42 = vmax.f32 %v495_v29, 0.0  ;;  %v236_v52 = vld [vmem:[%s828_s23 + $0x68] sm:$0xff]  ;;  %v437_v56 = vld [vmem:[%s834_s26 + $0x40] sm:$0xff]  ;;  %v439_v61 = vld [vmem:[%s834_s26 + $0x50] sm:$0xff] }
  0x18   : > { %v498_v43 = vadd.f32 %v434_v28, %v370_v30  ;;  %v372_v45 = vadd.f32 %v840_v2, %v301_v32  ;;  %v560_v48 = vmax.f32 %v496_v37, 0.0  ;;  %v302_v50 = vmul.f32 %v822_v0, %v231_v33  ;;  %v438_v57 = vld [vmem:[%s834_s26 + $0x48] sm:$0xff]  ;;  %v237_v1 = vld [vmem:[%s828_s23 + $0x70] sm:$0xff]  ;;  %v238_v3 = vld [vmem:[%s828_s23 + $0x78] sm:$0xff] }
  0x19   : > { %621 = vst [vmem:[%s870_s5] sm:$0xff] %v557_v35  ;;  %622 = vst [vmem:[%s870_s5 + $0x8] sm:$0xff] %v558_v36  ;;  %v561_v49 = vmax.f32 %v497_v38, 0.0  ;;  %v303_v51 = vmul.f32 %v822_v0, %v232_v34  ;;  %v499_v54 = vadd.f32 %v435_v39, %v371_v44  ;;  %v304_v58 = vmul.f32 %v822_v0, %v233_v41  ;;  %v440_v7 = vld [vmem:[%s834_s26 + $0x58] sm:$0xff]  ;;  %v441_v8 = vld [vmem:[%s834_s26 + $0x60] sm:$0xff] }
  0x1a   : > { %623 = vst [vmem:[%s870_s5 + $0x10] sm:$0xff] %v559_v42  ;;  %v562_v53 = vmax.f32 %v498_v43, 0.0  ;;  %v500_v55 = vadd.f32 %v436_v40, %v372_v45  ;;  %624 = vst [vmem:[%s870_s5 + $0x18] sm:$0xff] %v560_v48  ;;  %v373_v59 = vadd.f32 %v840_v2, %v302_v50  ;;  %v305_v62 = vmul.f32 %v822_v0, %v234_v46  ;;  %v442_v14 = vld [vmem:[%s834_s26 + $0x68] sm:$0xff]  ;;  %v239_v19 = vld [vmem:[%s828_s23 + $0x80] sm:$0xff] }
  0x1b   : > { %625 = vst [vmem:[%s870_s5 + $0x20] sm:$0xff] %v561_v49  ;;  %v374_v60 = vadd.f32 %v840_v2, %v303_v51  ;;  %v306_v63 = vmul.f32 %v822_v0, %v235_v47  ;;  %v563_v4 = vmax.f32 %v499_v54, 0.0  ;;  %v375_v6 = vadd.f32 %v840_v2, %v304_v58  ;;  %v240_v20 = vld [vmem:[%s828_s23 + $0x88] sm:$0xff]  ;;  %v443_v25 = vld [vmem:[%s834_s26 + $0x70] sm:$0xff]  ;;  %v444_v26 = vld [vmem:[%s834_s26 + $0x78] sm:$0xff] }
  0x1c   : > { %626 = vst [vmem:[%s870_s5 + $0x28] sm:$0xff] %v562_v53  ;;  %v564_v5 = vmax.f32 %v500_v55, 0.0  ;;  %v307_v9 = vmul.f32 %v822_v0, %v236_v52  ;;  %v501_v10 = vadd.f32 %v437_v56, %v373_v59  ;;  %v376_v12 = vadd.f32 %v840_v2, %v305_v62  ;;  %v241_v27 = vld [vmem:[%s828_s23 + $0x90] sm:$0xff]  ;;  %v242_v32 = vld [vmem:[%s828_s23 + $0x98] sm:$0xff]  ;;  %v243_v33 = vld [vmem:[%s828_s23 + $0xa0] sm:$0xff] }
  0x1d   : > { %v502_v11 = vadd.f32 %v438_v57, %v374_v60  ;;  %v377_v13 = vadd.f32 %v840_v2, %v306_v63  ;;  %627 = vst [vmem:[%s870_s5 + $0x30] sm:$0xff] %v563_v4  ;;  %v503_v15 = vadd.f32 %v439_v61, %v375_v6  ;;  %v308_v17 = vmul.f32 %v822_v0, %v237_v1  ;;  %v244_v38 = vld [vmem:[%s828_s23 + $0xa8] sm:$0xff]  ;;  %v445_v42 = vld [vmem:[%s834_s26 + $0x80] sm:$0xff]  ;;  %v447_v47 = vld [vmem:[%s834_s26 + $0x90] sm:$0xff] }
  0x1e   : > { %628 = vst [vmem:[%s870_s5 + $0x38] sm:$0xff] %v564_v5  ;;  %v378_v16 = vadd.f32 %v840_v2, %v307_v9  ;;  %v309_v18 = vmul.f32 %v822_v0, %v238_v3  ;;  %v565_v21 = vmax.f32 %v501_v10, 0.0  ;;  %v504_v23 = vadd.f32 %v440_v7, %v376_v12  ;;  %v446_v43 = vld [vmem:[%s834_s26 + $0x88] sm:$0xff]  ;;  %v245_v50 = vld [vmem:[%s828_s23 + $0xb0] sm:$0xff]  ;;  %v246_v51 = vld [vmem:[%s828_s23 + $0xb8] sm:$0xff] }
  0x1f   : > { %v566_v22 = vmax.f32 %v502_v11, 0.0  ;;  %v505_v24 = vadd.f32 %v441_v8, %v377_v13  ;;  %v567_v28 = vmax.f32 %v503_v15, 0.0  ;;  %v379_v30 = vadd.f32 %v840_v2, %v308_v17  ;;  %v448_v55 = vld [vmem:[%s834_s26 + $0x98] sm:$0xff]  ;;  %v449_v56 = vld [vmem:[%s834_s26 + $0xa0] sm:$0xff]  ;;  %v450_v62 = vld [vmem:[%s834_s26 + $0xa8] sm:$0xff] }
  0x20   : > { %v506_v29 = vadd.f32 %v442_v14, %v378_v16  ;;  %v380_v31 = vadd.f32 %v840_v2, %v309_v18  ;;  %629 = vst [vmem:[%s870_s5 + $0x40] sm:$0xff] %v565_v21  ;;  %v568_v34 = vmax.f32 %v504_v23, 0.0  ;;  %v310_v36 = vmul.f32 %v822_v0, %v239_v19  ;;  %v247_v5 = vld [vmem:[%s828_s23 + $0xc0] sm:$0xff]  ;;  %v248_v6 = vld [vmem:[%s828_s23 + $0xc8] sm:$0xff]  ;;  %v451_v11 = vld [vmem:[%s834_s26 + $0xb0] sm:$0xff] }
  0x21   : > { %630 = vst [vmem:[%s870_s5 + $0x48] sm:$0xff] %v566_v22  ;;  %v569_v35 = vmax.f32 %v505_v24, 0.0  ;;  %v311_v37 = vmul.f32 %v822_v0, %v240_v20  ;;  %631 = vst [vmem:[%s870_s5 + $0x50] sm:$0xff] %v567_v28  ;;  %v507_v40 = vadd.f32 %v443_v25, %v379_v30  ;;  %v312_v44 = vmul.f32 %v822_v0, %v241_v27  ;;  %v452_v12 = vld [vmem:[%s834_s26 + $0xb8] sm:$0xff]  ;;  %v249_v13 = vld [vmem:[%s828_s23 + $0xd0] sm:$0xff] }
  0x22   : > { %v570_v39 = vmax.f32 %v506_v29, 0.0  ;;  %v508_v41 = vadd.f32 %v444_v26, %v380_v31  ;;  %632 = vst [vmem:[%s870_s5 + $0x58] sm:$0xff] %v568_v34  ;;  %v381_v45 = vadd.f32 %v840_v2, %v310_v36  ;;  %v313_v48 = vmul.f32 %v822_v0, %v242_v32  ;;  %v250_v18 = vld [vmem:[%s828_s23 + $0xd8] sm:$0xff]  ;;  %v251_v19 = vld [vmem:[%s828_s23 + $0xe0] sm:$0xff]  ;;  %v252_v24 = vld [vmem:[%s828_s23 + $0xe8] sm:$0xff] }
  0x23   : > { %633 = vst [vmem:[%s870_s5 + $0x60] sm:$0xff] %v569_v35  ;;  %v382_v46 = vadd.f32 %v840_v2, %v311_v37  ;;  %v314_v49 = vmul.f32 %v822_v0, %v243_v33  ;;  %v571_v52 = vmax.f32 %v507_v40, 0.0  ;;  %v383_v54 = vadd.f32 %v840_v2, %v312_v44  ;;  %v453_v28 = vld [vmem:[%s834_s26 + $0xc0] sm:$0xff]  ;;  %v454_v29 = vld [vmem:[%s834_s26 + $0xc8] sm:$0xff]  ;;  %v455_v33 = vld [vmem:[%s834_s26 + $0xd0] sm:$0xff] }
  0x24   : > { %634 = vst [vmem:[%s870_s5 + $0x68] sm:$0xff] %v570_v39  ;;  %v572_v53 = vmax.f32 %v508_v41, 0.0  ;;  %v315_v57 = vmul.f32 %v822_v0, %v244_v38  ;;  %v509_v58 = vadd.f32 %v445_v42, %v381_v45  ;;  %v384_v60 = vadd.f32 %v840_v2, %v313_v48  ;;  %v253_v36 = vld [vmem:[%s828_s23 + $0xf0] sm:$0xff]  ;;  %v254_v37 = vld [vmem:[%s828_s23 + $0xf8] sm:$0xff]  ;;  %v457_v42 = vld [vmem:[%s834_s26 + $0xe0] sm:$0xff] }
  0x25   : > { %v510_v59 = vadd.f32 %v446_v43, %v382_v46  ;;  %v385_v61 = vadd.f32 %v840_v2, %v314_v49  ;;  %635 = vst [vmem:[%s870_s5 + $0x70] sm:$0xff] %v571_v52  ;;  %v511_v63 = vadd.f32 %v447_v47, %v383_v54  ;;  %v316_v3 = vmul.f32 %v822_v0, %v245_v50  ;;  %v456_v41 = vld [vmem:[%s834_s26 + $0xd8] sm:$0xff]  ;;  %v458_v48 = vld [vmem:[%s834_s26 + $0xe8] sm:$0xff] }
  0x26   : > { %636 = vst [vmem:[%s870_s5 + $0x78] sm:$0xff] %v572_v53  ;;  %v386_v1 = vadd.f32 %v840_v2, %v315_v57  ;;  %v317_v4 = vmul.f32 %v822_v0, %v246_v51  ;;  %v573_v7 = vmax.f32 %v509_v58, 0.0  ;;  %v512_v9 = vadd.f32 %v448_v55, %v384_v60  ;;  %v255_v53 = vld [vmem:[%s828_s23 + $0x100] sm:$0xff]  ;;  %v256_v54 = vld [vmem:[%s828_s23 + $0x108] sm:$0xff]  ;;  %v460_v60 = vld [vmem:[%s834_s26 + $0xf8] sm:$0xff] }
  0x27   : > { %v574_v8 = vmax.f32 %v510_v59, 0.0  ;;  %v513_v10 = vadd.f32 %v449_v56, %v385_v61  ;;  %v575_v14 = vmax.f32 %v511_v63, 0.0  ;;  %v387_v16 = vadd.f32 %v840_v2, %v316_v3  ;;  %v459_v59 = vld [vmem:[%s834_s26 + $0xf0] sm:$0xff] }
  0x28   : > { %v514_v15 = vadd.f32 %v450_v62, %v386_v1  ;;  %v388_v17 = vadd.f32 %v840_v2, %v317_v4  ;;  %637 = vst [vmem:[%s870_s5 + $0x80] sm:$0xff] %v573_v7  ;;  %v576_v20 = vmax.f32 %v512_v9, 0.0  ;;  %v318_v22 = vmul.f32 %v822_v0, %v247_v5  ;;  %v257_v61 = vld [vmem:[%s828_s23 + $0x110] sm:$0xff]  ;;  %v258_v4 = vld [vmem:[%s828_s23 + $0x118] sm:$0xff]  ;;  %v259_v5 = vld [vmem:[%s828_s23 + $0x120] sm:$0xff] }
  0x29   : > { %638 = vst [vmem:[%s870_s5 + $0x88] sm:$0xff] %v574_v8  ;;  %v577_v21 = vmax.f32 %v513_v10, 0.0  ;;  %v319_v23 = vmul.f32 %v822_v0, %v248_v6  ;;  %639 = vst [vmem:[%s870_s5 + $0x90] sm:$0xff] %v575_v14  ;;  %v515_v26 = vadd.f32 %v451_v11, %v387_v16  ;;  %v320_v30 = vmul.f32 %v822_v0, %v249_v13  ;;  %v260_v10 = vld [vmem:[%s828_s23 + $0x128] sm:$0xff]  ;;  %v461_v14 = vld [vmem:[%s834_s26 + $0x100] sm:$0xff] }
  0x2a   : > { %v578_v25 = vmax.f32 %v514_v15, 0.0  ;;  %v516_v27 = vadd.f32 %v452_v12, %v388_v17  ;;  %640 = vst [vmem:[%s870_s5 + $0x98] sm:$0xff] %v576_v20  ;;  %v389_v31 = vadd.f32 %v840_v2, %v318_v22  ;;  %v321_v34 = vmul.f32 %v822_v0, %v250_v18  ;;  %v462_v15 = vld [vmem:[%s834_s26 + $0x108] sm:$0xff]  ;;  %v261_v22 = vld [vmem:[%s828_s23 + $0x130] sm:$0xff] }
  0x2b   : > { %641 = vst [vmem:[%s870_s5 + $0xa0] sm:$0xff] %v577_v21  ;;  %v390_v32 = vadd.f32 %v840_v2, %v319_v23  ;;  %v322_v35 = vmul.f32 %v822_v0, %v251_v19  ;;  %v579_v38 = vmax.f32 %v515_v26, 0.0  ;;  %v391_v40 = vadd.f32 %v840_v2, %v320_v30  ;;  %v463_v19 = vld [vmem:[%s834_s26 + $0x110] sm:$0xff]  ;;  %v262_v23 = vld [vmem:[%s828_s23 + $0x138] sm:$0xff] }
  0x2c   : > { %642 = vst [vmem:[%s870_s5 + $0xa8] sm:$0xff] %v578_v25  ;;  %v580_v39 = vmax.f32 %v516_v27, 0.0  ;;  %v323_v43 = vmul.f32 %v822_v0, %v252_v24  ;;  %v517_v44 = vadd.f32 %v453_v28, %v389_v31  ;;  %v392_v46 = vadd.f32 %v840_v2, %v321_v34  ;;  %v464_v27 = vld [vmem:[%s834_s26 + $0x118] sm:$0xff]  ;;  %v465_v28 = vld [vmem:[%s834_s26 + $0x120] sm:$0xff]  ;;  %v466_v34 = vld [vmem:[%s834_s26 + $0x128] sm:$0xff] }
  0x2d   : > { %v518_v45 = vadd.f32 %v454_v29, %v390_v32  ;;  %v393_v47 = vadd.f32 %v840_v2, %v322_v35  ;;  %643 = vst [vmem:[%s870_s5 + $0xb0] sm:$0xff] %v579_v38  ;;  %v519_v49 = vadd.f32 %v455_v33, %v391_v40  ;;  %v324_v51 = vmul.f32 %v822_v0, %v253_v36  ;;  %v264_v40 = vld [vmem:[%s828_s23 + $0x148] sm:$0xff] }
  0x2e   : > { %644 = vst [vmem:[%s870_s5 + $0xb8] sm:$0xff] %v580_v39  ;;  %v394_v50 = vadd.f32 %v840_v2, %v323_v43  ;;  %v325_v52 = vmul.f32 %v822_v0, %v254_v37  ;;  %v581_v55 = vmax.f32 %v517_v44, 0.0  ;;  %v520_v57 = vadd.f32 %v456_v41, %v392_v46  ;;  %v263_v39 = vld [vmem:[%s828_s23 + $0x140] sm:$0xff]  ;;  %v468_v46 = vld [vmem:[%s834_s26 + $0x138] sm:$0xff] }
  0x2f   : > { %v582_v56 = vmax.f32 %v518_v45, 0.0  ;;  %v521_v58 = vadd.f32 %v457_v42, %v393_v47  ;;  %v583_v62 = vmax.f32 %v519_v49, 0.0  ;;  %v395_v1 = vadd.f32 %v840_v2, %v324_v51  ;;  %v467_v45 = vld [vmem:[%s834_s26 + $0x130] sm:$0xff] }
  0x30   : > { %v522_v63 = vadd.f32 %v458_v48, %v394_v50  ;;  %v396_v3 = vadd.f32 %v840_v2, %v325_v52  ;;  %645 = vst [vmem:[%s870_s5 + $0xc0] sm:$0xff] %v581_v55  ;;  %v584_v6 = vmax.f32 %v520_v57, 0.0  ;;  %v326_v8 = vmul.f32 %v822_v0, %v255_v53  ;;  %v265_v47 = vld [vmem:[%s828_s23 + $0x150] sm:$0xff]  ;;  %v266_v52 = vld [vmem:[%s828_s23 + $0x158] sm:$0xff]  ;;  %v267_v53 = vld [vmem:[%s828_s23 + $0x160] sm:$0xff] }
  0x31   : > { %646 = vst [vmem:[%s870_s5 + $0xc8] sm:$0xff] %v582_v56  ;;  %v585_v7 = vmax.f32 %v521_v58, 0.0  ;;  %v327_v9 = vmul.f32 %v822_v0, %v256_v54  ;;  %647 = vst [vmem:[%s870_s5 + $0xd0] sm:$0xff] %v583_v62  ;;  %v523_v12 = vadd.f32 %v459_v59, %v395_v1  ;;  %v328_v16 = vmul.f32 %v822_v0, %v257_v61  ;;  %v268_v58 = vld [vmem:[%s828_s23 + $0x168] sm:$0xff]  ;;  %v469_v62 = vld [vmem:[%s834_s26 + $0x140] sm:$0xff] }
  0x32   : > { %v586_v11 = vmax.f32 %v522_v63, 0.0  ;;  %v524_v13 = vadd.f32 %v460_v60, %v396_v3  ;;  %648 = vst [vmem:[%s870_s5 + $0xd8] sm:$0xff] %v584_v6  ;;  %v397_v17 = vadd.f32 %v840_v2, %v326_v8  ;;  %v329_v20 = vmul.f32 %v822_v0, %v258_v4  ;;  %v470_v63 = vld [vmem:[%s834_s26 + $0x148] sm:$0xff]  ;;  %v269_v8 = vld [vmem:[%s828_s23 + $0x170] sm:$0xff] }
  0x33   : > { %649 = vst [vmem:[%s870_s5 + $0xe0] sm:$0xff] %v585_v7  ;;  %v398_v18 = vadd.f32 %v840_v2, %v327_v9  ;;  %v330_v21 = vmul.f32 %v822_v0, %v259_v5  ;;  %v587_v24 = vmax.f32 %v523_v12, 0.0  ;;  %v399_v26 = vadd.f32 %v840_v2, %v328_v16  ;;  %v471_v5 = vld [vmem:[%s834_s26 + $0x150] sm:$0xff]  ;;  %v270_v9 = vld [vmem:[%s828_s23 + $0x178] sm:$0xff] }
  0x34   : > { %650 = vst [vmem:[%s870_s5 + $0xe8] sm:$0xff] %v586_v11  ;;  %v588_v25 = vmax.f32 %v524_v13, 0.0  ;;  %v331_v29 = vmul.f32 %v822_v0, %v260_v10  ;;  %v525_v30 = vadd.f32 %v461_v14, %v397_v17  ;;  %v400_v32 = vadd.f32 %v840_v2, %v329_v20  ;;  %v472_v13 = vld [vmem:[%s834_s26 + $0x158] sm:$0xff]  ;;  %v473_v14 = vld [vmem:[%s834_s26 + $0x160] sm:$0xff]  ;;  %v474_v20 = vld [vmem:[%s834_s26 + $0x168] sm:$0xff] }
  0x35   : > { %v526_v31 = vadd.f32 %v462_v15, %v398_v18  ;;  %v401_v33 = vadd.f32 %v840_v2, %v330_v21  ;;  %651 = vst [vmem:[%s870_s5 + $0xf0] sm:$0xff] %v587_v24  ;;  %v527_v35 = vadd.f32 %v463_v19, %v399_v26  ;;  %v332_v37 = vmul.f32 %v822_v0, %v261_v22  ;;  %v272_v26 = vld [vmem:[%s828_s23 + $0x188] sm:$0xff] }
  0x36   : > { %652 = vst [vmem:[%s870_s5 + $0xf8] sm:$0xff] %v588_v25  ;;  %v402_v36 = vadd.f32 %v840_v2, %v331_v29  ;;  %v333_v38 = vmul.f32 %v822_v0, %v262_v23  ;;  %v589_v41 = vmax.f32 %v525_v30, 0.0  ;;  %v528_v43 = vadd.f32 %v464_v27, %v400_v32  ;;  %v271_v25 = vld [vmem:[%s828_s23 + $0x180] sm:$0xff]  ;;  %v476_v32 = vld [vmem:[%s834_s26 + $0x178] sm:$0xff] }
  0x37   : > { %v590_v42 = vmax.f32 %v526_v31, 0.0  ;;  %v529_v44 = vadd.f32 %v465_v28, %v401_v33  ;;  %v591_v48 = vmax.f32 %v527_v35, 0.0  ;;  %v403_v50 = vadd.f32 %v840_v2, %v332_v37  ;;  %v475_v31 = vld [vmem:[%s834_s26 + $0x170] sm:$0xff] }
  0x38   : > { %v530_v49 = vadd.f32 %v466_v34, %v402_v36  ;;  %v404_v51 = vadd.f32 %v840_v2, %v333_v38  ;;  %653 = vst [vmem:[%s870_s5 + $0x100] sm:$0xff] %v589_v41  ;;  %v592_v54 = vmax.f32 %v528_v43, 0.0  ;;  %v334_v56 = vmul.f32 %v822_v0, %v263_v39  ;;  %v273_v33 = vld [vmem:[%s828_s23 + $0x190] sm:$0xff]  ;;  %v274_v38 = vld [vmem:[%s828_s23 + $0x198] sm:$0xff]  ;;  %v275_v39 = vld [vmem:[%s828_s23 + $0x1a0] sm:$0xff] }
  0x39   : > { %654 = vst [vmem:[%s870_s5 + $0x108] sm:$0xff] %v590_v42  ;;  %v593_v55 = vmax.f32 %v529_v44, 0.0  ;;  %v335_v57 = vmul.f32 %v822_v0, %v264_v40  ;;  %655 = vst [vmem:[%s870_s5 + $0x110] sm:$0xff] %v591_v48  ;;  %v531_v60 = vadd.f32 %v467_v45, %v403_v50  ;;  %v336_v1 = vmul.f32 %v822_v0, %v265_v47  ;;  %v276_v44 = vld [vmem:[%s828_s23 + $0x1a8] sm:$0xff]  ;;  %v477_v48 = vld [vmem:[%s834_s26 + $0x180] sm:$0xff] }
  0x3a   : > { %v594_v59 = vmax.f32 %v530_v49, 0.0  ;;  %v532_v61 = vadd.f32 %v468_v46, %v404_v51  ;;  %656 = vst [vmem:[%s870_s5 + $0x118] sm:$0xff] %v592_v54  ;;  %v405_v3 = vadd.f32 %v840_v2, %v334_v56  ;;  %v337_v6 = vmul.f32 %v822_v0, %v266_v52  ;;  %v478_v49 = vld [vmem:[%s834_s26 + $0x188] sm:$0xff]  ;;  %v277_v56 = vld [vmem:[%s828_s23 + $0x1b0] sm:$0xff] }
  0x3b   : > { %657 = vst [vmem:[%s870_s5 + $0x120] sm:$0xff] %v593_v55  ;;  %v406_v4 = vadd.f32 %v840_v2, %v335_v57  ;;  %v338_v7 = vmul.f32 %v822_v0, %v267_v53  ;;  %v595_v10 = vmax.f32 %v531_v60, 0.0  ;;  %v407_v12 = vadd.f32 %v840_v2, %v336_v1  ;;  %v479_v53 = vld [vmem:[%s834_s26 + $0x190] sm:$0xff]  ;;  %v278_v57 = vld [vmem:[%s828_s23 + $0x1b8] sm:$0xff] }
  0x3c   : > { %658 = vst [vmem:[%s870_s5 + $0x128] sm:$0xff] %v594_v59  ;;  %v596_v11 = vmax.f32 %v532_v61, 0.0  ;;  %v339_v15 = vmul.f32 %v822_v0, %v268_v58  ;;  %v533_v16 = vadd.f32 %v469_v62, %v405_v3  ;;  %v408_v18 = vadd.f32 %v840_v2, %v337_v6  ;;  %v480_v61 = vld [vmem:[%s834_s26 + $0x198] sm:$0xff]  ;;  %v481_v62 = vld [vmem:[%s834_s26 + $0x1a0] sm:$0xff]  ;;  %v482_v6 = vld [vmem:[%s834_s26 + $0x1a8] sm:$0xff] }
  0x3d   : > { %v534_v17 = vadd.f32 %v470_v63, %v406_v4  ;;  %v409_v19 = vadd.f32 %v840_v2, %v338_v7  ;;  %659 = vst [vmem:[%s870_s5 + $0x130] sm:$0xff] %v595_v10  ;;  %v535_v21 = vadd.f32 %v471_v5, %v407_v12  ;;  %v340_v23 = vmul.f32 %v822_v0, %v269_v8  ;;  %v280_v12 = vld [vmem:[%s828_s23 + $0x1c8] sm:$0xff] }
  0x3e   : > { %660 = vst [vmem:[%s870_s5 + $0x138] sm:$0xff] %v596_v11  ;;  %v410_v22 = vadd.f32 %v840_v2, %v339_v15  ;;  %v341_v24 = vmul.f32 %v822_v0, %v270_v9  ;;  %v597_v27 = vmax.f32 %v533_v16, 0.0  ;;  %v536_v29 = vadd.f32 %v472_v13, %v408_v18  ;;  %v279_v11 = vld [vmem:[%s828_s23 + $0x1c0] sm:$0xff]  ;;  %v484_v18 = vld [vmem:[%s834_s26 + $0x1b8] sm:$0xff] }
  0x3f   : > { %v598_v28 = vmax.f32 %v534_v17, 0.0  ;;  %v537_v30 = vadd.f32 %v473_v14, %v409_v19  ;;  %v599_v34 = vmax.f32 %v535_v21, 0.0  ;;  %v411_v36 = vadd.f32 %v840_v2, %v340_v23  ;;  %v483_v17 = vld [vmem:[%s834_s26 + $0x1b0] sm:$0xff] }
  0x40   : > { %v538_v35 = vadd.f32 %v474_v20, %v410_v22  ;;  %v412_v37 = vadd.f32 %v840_v2, %v341_v24  ;;  %661 = vst [vmem:[%s870_s5 + $0x140] sm:$0xff] %v597_v27  ;;  %v600_v40 = vmax.f32 %v536_v29, 0.0  ;;  %v342_v42 = vmul.f32 %v822_v0, %v271_v25  ;;  %v281_v19 = vld [vmem:[%s828_s23 + $0x1d0] sm:$0xff]  ;;  %v282_v24 = vld [vmem:[%s828_s23 + $0x1d8] sm:$0xff]  ;;  %v283_v25 = vld [vmem:[%s828_s23 + $0x1e0] sm:$0xff] }
  0x41   : > { %662 = vst [vmem:[%s870_s5 + $0x148] sm:$0xff] %v598_v28  ;;  %v601_v41 = vmax.f32 %v537_v30, 0.0  ;;  %v343_v43 = vmul.f32 %v822_v0, %v272_v26  ;;  %663 = vst [vmem:[%s870_s5 + $0x150] sm:$0xff] %v599_v34  ;;  %v539_v46 = vadd.f32 %v475_v31, %v411_v36  ;;  %v344_v50 = vmul.f32 %v822_v0, %v273_v33  ;;  %v284_v30 = vld [vmem:[%s828_s23 + $0x1e8] sm:$0xff]  ;;  %v485_v34 = vld [vmem:[%s834_s26 + $0x1c0] sm:$0xff] }
  0x42   : > { %v602_v45 = vmax.f32 %v538_v35, 0.0  ;;  %v540_v47 = vadd.f32 %v476_v32, %v412_v37  ;;  %664 = vst [vmem:[%s870_s5 + $0x158] sm:$0xff] %v600_v40  ;;  %v413_v51 = vadd.f32 %v840_v2, %v342_v42  ;;  %v345_v54 = vmul.f32 %v822_v0, %v274_v38  ;;  %v486_v35 = vld [vmem:[%s834_s26 + $0x1c8] sm:$0xff]  ;;  %v285_v42 = vld [vmem:[%s828_s23 + $0x1f0] sm:$0xff] }
  0x43   : > { %665 = vst [vmem:[%s870_s5 + $0x160] sm:$0xff] %v601_v41  ;;  %v414_v52 = vadd.f32 %v840_v2, %v343_v43  ;;  %v346_v55 = vmul.f32 %v822_v0, %v275_v39  ;;  %v603_v58 = vmax.f32 %v539_v46, 0.0  ;;  %v415_v60 = vadd.f32 %v840_v2, %v344_v50  ;;  %v487_v39 = vld [vmem:[%s834_s26 + $0x1d0] sm:$0xff]  ;;  %v286_v43 = vld [vmem:[%s828_s23 + $0x1f8] sm:$0xff] }
  0x44   : > { %666 = vst [vmem:[%s870_s5 + $0x168] sm:$0xff] %v602_v45  ;;  %v604_v59 = vmax.f32 %v540_v47, 0.0  ;;  %v347_v63 = vmul.f32 %v822_v0, %v276_v44  ;;  %v541_v1 = vadd.f32 %v477_v48, %v413_v51  ;;  %v416_v4 = vadd.f32 %v840_v2, %v345_v54  ;;  %v488_v47 = vld [vmem:[%s834_s26 + $0x1d8] sm:$0xff]  ;;  %v489_v48 = vld [vmem:[%s834_s26 + $0x1e0] sm:$0xff]  ;;  %v490_v54 = vld [vmem:[%s834_s26 + $0x1e8] sm:$0xff] }
  0x45   : > { %v542_v3 = vadd.f32 %v478_v49, %v414_v52  ;;  %v417_v5 = vadd.f32 %v840_v2, %v346_v55  ;;  %667 = vst [vmem:[%s870_s5 + $0x170] sm:$0xff] %v603_v58  ;;  %v543_v7 = vadd.f32 %v479_v53, %v415_v60  ;;  %v348_v9 = vmul.f32 %v822_v0, %v277_v56 }
  0x46   : > { %668 = vst [vmem:[%s870_s5 + $0x178] sm:$0xff] %v604_v59  ;;  %v418_v8 = vadd.f32 %v840_v2, %v347_v63  ;;  %v349_v10 = vmul.f32 %v822_v0, %v278_v57  ;;  %v605_v13 = vmax.f32 %v541_v1, 0.0  ;;  %v544_v15 = vadd.f32 %v480_v61, %v416_v4  ;;  %v491_v63 = vld [vmem:[%s834_s26 + $0x1f0] sm:$0xff]  ;;  %v492_v1 = vld [vmem:[%s834_s26 + $0x1f8] sm:$0xff] }
  0x47   : > { %v606_v14 = vmax.f32 %v542_v3, 0.0  ;;  %v545_v16 = vadd.f32 %v481_v62, %v417_v5  ;;  %v607_v20 = vmax.f32 %v543_v7, 0.0  ;;  %v419_v22 = vadd.f32 %v840_v2, %v348_v9 }
  0x48   : > { %v546_v21 = vadd.f32 %v482_v6, %v418_v8  ;;  %v420_v23 = vadd.f32 %v840_v2, %v349_v10  ;;  %669 = vst [vmem:[%s870_s5 + $0x180] sm:$0xff] %v605_v13  ;;  %v608_v26 = vmax.f32 %v544_v15, 0.0  ;;  %v350_v28 = vmul.f32 %v822_v0, %v279_v11 }
  0x49   : > { %670 = vst [vmem:[%s870_s5 + $0x188] sm:$0xff] %v606_v14  ;;  %v609_v27 = vmax.f32 %v545_v16, 0.0  ;;  %v351_v29 = vmul.f32 %v822_v0, %v280_v12  ;;  %671 = vst [vmem:[%s870_s5 + $0x190] sm:$0xff] %v607_v20  ;;  %v547_v32 = vadd.f32 %v483_v17, %v419_v22  ;;  %v352_v36 = vmul.f32 %v822_v0, %v281_v19 }
  0x4a   : > { %v610_v31 = vmax.f32 %v546_v21, 0.0  ;;  %v548_v33 = vadd.f32 %v484_v18, %v420_v23  ;;  %672 = vst [vmem:[%s870_s5 + $0x198] sm:$0xff] %v608_v26  ;;  %v421_v37 = vadd.f32 %v840_v2, %v350_v28  ;;  %v353_v40 = vmul.f32 %v822_v0, %v282_v24 }
  0x4b   : > { %673 = vst [vmem:[%s870_s5 + $0x1a0] sm:$0xff] %v609_v27  ;;  %v422_v38 = vadd.f32 %v840_v2, %v351_v29  ;;  %v354_v41 = vmul.f32 %v822_v0, %v283_v25  ;;  %v611_v44 = vmax.f32 %v547_v32, 0.0  ;;  %v423_v46 = vadd.f32 %v840_v2, %v352_v36 }
  0x4c   : > { %674 = vst [vmem:[%s870_s5 + $0x1a8] sm:$0xff] %v610_v31  ;;  %v612_v45 = vmax.f32 %v548_v33, 0.0  ;;  %v355_v49 = vmul.f32 %v822_v0, %v284_v30  ;;  %v549_v50 = vadd.f32 %v485_v34, %v421_v37  ;;  %v424_v52 = vadd.f32 %v840_v2, %v353_v40 }
  0x4d   : > { %v550_v51 = vadd.f32 %v486_v35, %v422_v38  ;;  %v425_v53 = vadd.f32 %v840_v2, %v354_v41  ;;  %675 = vst [vmem:[%s870_s5 + $0x1b0] sm:$0xff] %v611_v44  ;;  %v551_v55 = vadd.f32 %v487_v39, %v423_v46  ;;  %v356_v57 = vmul.f32 %v822_v0, %v285_v42 }
  0x4e   : > { %676 = vst [vmem:[%s870_s5 + $0x1b8] sm:$0xff] %v612_v45  ;;  %v426_v56 = vadd.f32 %v840_v2, %v355_v49  ;;  %v357_v58 = vmul.f32 %v822_v0, %v286_v43  ;;  %v613_v59 = vmax.f32 %v549_v50, 0.0  ;;  %v552_v61 = vadd.f32 %v488_v47, %v424_v52 }
  0x4f   : > { %v614_v60 = vmax.f32 %v550_v51, 0.0  ;;  %v553_v62 = vadd.f32 %v489_v48, %v425_v53  ;;  %v615_v3 = vmax.f32 %v551_v55, 0.0  ;;  %v427_v5 = vadd.f32 %v840_v2, %v356_v57 }
  0x50   : > { %v554_v4 = vadd.f32 %v490_v54, %v426_v56  ;;  %v428_v6 = vadd.f32 %v840_v2, %v357_v58  ;;  %677 = vst [vmem:[%s870_s5 + $0x1c0] sm:$0xff] %v613_v59  ;;  %v616_v0 = vmax.f32 %v552_v61, 0.0 }
  0x51   : > { %678 = vst [vmem:[%s870_s5 + $0x1c8] sm:$0xff] %v614_v60  ;;  %v617_v7 = vmax.f32 %v553_v62, 0.0  ;;  %679 = vst [vmem:[%s870_s5 + $0x1d0] sm:$0xff] %v615_v3  ;;  %v555_v9 = vadd.f32 %v491_v63, %v427_v5 }
  0x52   : > { %v618_v8 = vmax.f32 %v554_v4, 0.0  ;;  %v556_v10 = vadd.f32 %v492_v1, %v428_v6  ;;  %680 = vst [vmem:[%s870_s5 + $0x1d8] sm:$0xff] %v616_v0 }
  0x53   : > { %681 = vst [vmem:[%s870_s5 + $0x1e0] sm:$0xff] %v617_v7  ;;  %v619_v11 = vmax.f32 %v555_v9, 0.0 }
  0x54   : > { %682 = vst [vmem:[%s870_s5 + $0x1e8] sm:$0xff] %v618_v8  ;;  %v620_v12 = vmax.f32 %v556_v10, 0.0 }
  0x55   : > { %683 = vst [vmem:[%s870_s5 + $0x1f0] sm:$0xff] %v619_v11 }
  0x56   : > { %684 = vst [vmem:[%s870_s5 + $0x1f8] sm:$0xff] %v620_v12 }
  0x57 PF: > { %s14_s15 = sadd.s32 1, %s782_s15  }
  0x58   : > { %p11_p4 = scmp.ge.s32.totalorder %s14_s15, 18  }
  0x5a   :  { %13 = sbr.rel (!%p11_p4) target bundleno = 1 (0x1), region = 69 }

</bundles_post_ra>
